<compile_context>
chip_gen: v7x
topology: tpu7x:2x2x1
jax: 0.10.0
libtpu: 0.0.40
codegen_flags: <defaults>
</compile_context>

<pallas_src>
import functools
import math

import numpy as np
import jax
import jax.numpy as jnp
from jax import lax
from jax.experimental import pallas as pl
from jax.experimental.pallas import tpu as pltpu


def _torch_layernorm(x, gamma, beta, eps):
    # Matches the PyTorch LayerNorm in the spec: unbiased std, eps on std.
    mean = jnp.mean(x, axis=-1, keepdims=True)
    xc = x - mean
    var = jnp.sum(xc * xc, axis=-1, keepdims=True) / (x.shape[-1] - 1)
    std = jnp.sqrt(var)
    return gamma * xc / (std + eps) + beta


def _const_spec(shape):
    """Whole-array block with a constant index_map: DMA'd once, kept resident
    across grid steps (Pallas skips re-fetch when the block index repeats)."""
    zeros = (0,) * len(shape)
    return pl.BlockSpec(shape, lambda b: zeros)


# --------------------------------------------------------------------------
# Fused EncoderLayer kernel: one batch row per grid step.
#   sublayer 0: x1 = x  + SelfAttn(LN1(x), mask)
#   sublayer 1: out = x1 + FFN(LN2(x1))
# --------------------------------------------------------------------------
def _encoder_layer_kernel(x_ref, mask_ref,
                          g1_ref, b1n_ref,
                          wq_ref, bq_ref, wk_ref, bk_ref, wv_ref, bv_ref,
                          wo_ref, bo_ref,
                          g2_ref, b2n_ref,
                          w1_ref, bf1_ref, w2_ref, bf2_ref,
                          o_ref, *, n_heads, eps):
    x = x_ref[0].astype(jnp.float32)            # (S, D)
    m = mask_ref[0]                             # (1, S)  key-validity mask
    S, D = x.shape
    hd = D // n_heads
    scale = 1.0 / math.sqrt(hd)

    # ---- Sublayer 0: multi-head self-attention on LN1(x), residual add ----
    ln1 = _torch_layernorm(x, g1_ref[...], b1n_ref[...], eps)     # f32
    lnc = ln1.astype(wq_ref.dtype)                                # MXU feed dtype

    q = jnp.dot(lnc, wq_ref[...], preferred_element_type=jnp.float32) + bq_ref[...]
    k = jnp.dot(lnc, wk_ref[...], preferred_element_type=jnp.float32) + bk_ref[...]
    v = jnp.dot(lnc, wv_ref[...], preferred_element_type=jnp.float32) + bv_ref[...]

    acc = jnp.zeros((S, D), jnp.float32)
    for h in range(n_heads):                    # static unroll over heads
        sl = slice(h * hd, (h + 1) * hd)
        qh, kh, vh = q[:, sl], k[:, sl], v[:, sl]
        s = lax.dot_general(qh, kh, (((1,), (1,)), ((), ())),
                            preferred_element_type=jnp.float32) * scale
        s = jnp.where(m > 0, s, -1e9)           # mask invalid keys
        s = s - jnp.max(s, axis=-1, keepdims=True)
        p = jnp.exp(s)
        p = p / jnp.sum(p, axis=-1, keepdims=True)
        # TODO(synk): attention-prob dropout (training mode) not implemented.
        ctx = jnp.dot(p, vh, preferred_element_type=jnp.float32)          # (S, hd)
        # attn @ Wo == sum over heads of ctx_h @ Wo[h*hd:(h+1)*hd, :]
        acc = acc + jnp.dot(ctx.astype(wo_ref.dtype), wo_ref[sl, :],
                            preferred_element_type=jnp.float32)
    # TODO(synk): residual dropout (training mode) not implemented (identity).
    x1 = x + acc + bo_ref[...]

    # ---- Sublayer 1: position-wise FFN on LN2(x1), residual add ----
    ln2 = _torch_layernorm(x1, g2_ref[...], b2n_ref[...], eps)    # f32
    h1 = jnp.dot(ln2.astype(w1_ref.dtype), w1_ref[...],
                 preferred_element_type=jnp.float32)
    h1 = jnp.maximum(h1 + bf1_ref[...], 0.0)                      # bias + ReLU in f32
    y = jnp.dot(h1.astype(w2_ref.dtype), w2_ref[...],
                preferred_element_type=jnp.float32) + bf2_ref[...]
    o_ref[0] = (x1 + y).astype(o_ref.dtype)


def encoder_layer(x, mask, p, *, n_heads, eps=1e-6, compute_dtype=jnp.bfloat16):
    """EncoderLayer forward: two fused pre-norm residual sublayers."""
    B, S, D = x.shape
    F = p["w1"].shape[1]
    assert D % n_heads == 0
    f32 = jnp.float32

    mask3 = mask.reshape(B, 1, S).astype(f32)
    g1 = p["ln1_gamma"].reshape(1, D).astype(f32)
    b1n = p["ln1_beta"].reshape(1, D).astype(f32)
    g2 = p["ln2_gamma"].reshape(1, D).astype(f32)
    b2n = p["ln2_beta"].reshape(1, D).astype(f32)

    wq = p["wq"].astype(compute_dtype)
    wk = p["wk"].astype(compute_dtype)
    wv = p["wv"].astype(compute_dtype)
    wo = p["wo"].astype(compute_dtype)
    bq = p["bq"].reshape(1, D).astype(f32)
    bk = p["bk"].reshape(1, D).astype(f32)
    bv = p["bv"].reshape(1, D).astype(f32)
    bo = p["bo"].reshape(1, D).astype(f32)

    w1 = p["w1"].astype(compute_dtype)
    w2 = p["w2"].astype(compute_dtype)
    bf1 = p["b1"].reshape(1, F).astype(f32)
    bf2 = p["b2"].reshape(1, D).astype(f32)

    xi = x.dtype.itemsize
    wi = np.dtype(compute_dtype).itemsize

    weight_bytes = (4 * D * D + 2 * D * F) * wi
    bias_bytes = (8 * D + F) * 4
    tile_bytes = 2 * 2 * S * D * xi                       # x + out, double-buffered
    interm_bytes = (8 * S * D + 2 * S * F + 2 * n_heads * S * S) * 4
    vmem_est = 2 * weight_bytes + 2 * bias_bytes + tile_bytes + interm_bytes
    # Clamp to [32 MiB, 64 MiB]: legal on v5e/v6e (128 MiB phys) and v7x (64 MiB).
    vmem_limit = int(max(32 * 1024 * 1024, min(2 * vmem_est, 64 * 1024 * 1024)))

    flops = B * (4 * 2 * S * D * D + 2 * 2 * S * S * D + 2 * 2 * S * D * F)
    transcendentals = B * n_heads * S * S
    bytes_accessed = int(2 * B * S * D * xi + weight_bytes + bias_bytes
                         + B * S * 4)

    kernel = functools.partial(_encoder_layer_kernel, n_heads=n_heads, eps=eps)

    return pl.pallas_call(
        kernel,
        out_shape=jax.ShapeDtypeStruct((B, S, D), x.dtype),
        grid_spec=pltpu.PrefetchScalarGridSpec(
            num_scalar_prefetch=0,
            grid=(B,),
            in_specs=[
                pl.BlockSpec((1, S, D), lambda b: (b, 0, 0)),   # x (per batch)
                pl.BlockSpec((1, 1, S), lambda b: (b, 0, 0)),   # mask
                _const_spec((1, D)),                            # LN1 gamma
                _const_spec((1, D)),                            # LN1 beta
                _const_spec((D, D)), _const_spec((1, D)),       # Wq, bq
                _const_spec((D, D)), _const_spec((1, D)),       # Wk, bk
                _const_spec((D, D)), _const_spec((1, D)),       # Wv, bv
                _const_spec((D, D)), _const_spec((1, D)),       # Wo, bo
                _const_spec((1, D)),                            # LN2 gamma
                _const_spec((1, D)),                            # LN2 beta
                _const_spec((D, F)), _const_spec((1, F)),       # W1, b1
                _const_spec((F, D)), _const_spec((1, D)),       # W2, b2
            ],
            out_specs=pl.BlockSpec((1, S, D), lambda b: (b, 0, 0)),
        ),
        compiler_params=pltpu.CompilerParams(
            dimension_semantics=("parallel",),
            vmem_limit_bytes=vmem_limit),
        cost_estimate=pl.CostEstimate(flops=flops,
                                      transcendentals=transcendentals,
                                      bytes_accessed=bytes_accessed),
    )(x, mask3, g1, b1n,
      wq, bq, wk, bk, wv, bv, wo, bo,
      g2, b2n, w1, bf1, w2, bf2)


# --------------------------------------------------------------------------
# Pure-JAX reference mirroring the PyTorch module semantics
# --------------------------------------------------------------------------
def reference_encoder_layer(x, mask, p, *, n_heads, eps=1e-6):
    B, S, D = x.shape
    hd = D // n_heads

    ln = _torch_layernorm(x, p["ln1_gamma"], p["ln1_beta"], eps)
    q = jnp.dot(ln, p["wq"]) + p["bq"]
    k = jnp.dot(ln, p["wk"]) + p["bk"]
    v = jnp.dot(ln, p["wv"]) + p["bv"]

    def split(t):
        return t.reshape(B, S, n_heads, hd).transpose(0, 2, 1, 3)

    qh, kh, vh = split(q), split(k), split(v)
    scores = jnp.einsum("bhqd,bhkd->bhqk", qh, kh) / math.sqrt(hd)
    scores = jnp.where(mask.reshape(B, 1, 1, S) > 0, scores, -1e9)
    scores = scores - scores.max(-1, keepdims=True)
    attn = jnp.exp(scores)
    attn = attn / attn.sum(-1, keepdims=True)
    ctx = jnp.einsum("bhqk,bhkd->bhqd", attn, vh)
    ctx = ctx.transpose(0, 2, 1, 3).reshape(B, S, D)
    x = x + (jnp.dot(ctx, p["wo"]) + p["bo"])

    ln2 = _torch_layernorm(x, p["ln2_gamma"], p["ln2_beta"], eps)
    h = jnp.maximum(jnp.dot(ln2, p["w1"]) + p["b1"], 0.0)
    return x + (jnp.dot(h, p["w2"]) + p["b2"])


if __name__ == "__main__":
    batch, seq = 2, 8
    d_model, n_heads, d_ff = 128, 4, 256

    key = jax.random.PRNGKey(0)
    keys = jax.random.split(key, 16)

    def linear(kw, kb, fan_in, fan_out):
        # nn.Linear init; weight stored transposed as [in, out] so the kernel
        # runs plain row-major matmuls on the MXU.
        bound = 1.0 / math.sqrt(fan_in)
        w = jax.random.uniform(kw, (fan_in, fan_out), jnp.float32, -bound, bound)
        b = jax.random.uniform(kb, (fan_out,), jnp.float32, -bound, bound)
        return w, b

    x = jax.random.normal(keys[0], (batch, seq, d_model), jnp.float32)
    # key-validity mask: batch 0 fully visible, batch 1 masks its last 3 keys.
    mask = jnp.array([[1, 1, 1, 1, 1, 1, 1, 1],
                      [1, 1, 1, 1, 1, 0, 0, 0]], dtype=jnp.float32)

    wq, bq = linear(keys[1], keys[2], d_model, d_model)
    wk, bk = linear(keys[3], keys[4], d_model, d_model)
    wv, bv = linear(keys[5], keys[6], d_model, d_model)
    wo, bo = linear(keys[7], keys[8], d_model, d_model)
    w1, b1 = linear(keys[9], keys[10], d_model, d_ff)
    w2, b2 = linear(keys[11], keys[12], d_ff, d_model)

    params = dict(
        ln1_gamma=1.0 + 0.1 * jax.random.normal(keys[13], (d_model,), jnp.float32),
        ln1_beta=0.1 * jax.random.normal(keys[14], (d_model,), jnp.float32),
        ln2_gamma=1.0 + 0.1 * jax.random.normal(keys[15], (d_model,), jnp.float32),
        ln2_beta=jnp.zeros((d_model,), jnp.float32),
        wq=wq, bq=bq, wk=wk, bk=bk, wv=wv, bv=bv, wo=wo, bo=bo,
        w1=w1, b1=b1, w2=w2, b2=b2,
    )

    y_ref = reference_encoder_layer(x, mask, params, n_heads=n_heads)

    # f32-weight path (tolerance covers TPU's default matmul precision).
    y32 = encoder_layer(x, mask, params, n_heads=n_heads,
                        compute_dtype=jnp.float32)
    y32 = jax.block_until_ready(y32)
    assert y32.shape == (batch, seq, d_model)
    err32 = float(jnp.max(jnp.abs(y32 - y_ref)))
    assert jnp.allclose(y32, y_ref, atol=2e-2, rtol=2e-2), err32

    # bf16-weight path (default / MXU-optimized): looser tolerance for the
    # bf16 round-trips on matmul operands (accumulation stays f32).
    ybf = encoder_layer(x, mask, params, n_heads=n_heads,
                        compute_dtype=jnp.bfloat16)
    ybf = jax.block_until_ready(ybf)
    errbf = float(jnp.max(jnp.abs(ybf - y_ref)))
    assert jnp.allclose(ybf, y_ref, atol=5e-2, rtol=5e-2), errbf

    print("KERNEL_OK")
</pallas_src>

<mosaic_0001>
module attributes {stable_mosaic.version = 11 : i64} {
  func.func @_encoder_layer_kernel(%arg0: i32, %arg1: memref<1x8x128xf32, #tpu.memory_space<vmem>>, %arg2: memref<1x1x8xf32, #tpu.memory_space<vmem>>, %arg3: memref<1x128xf32, #tpu.memory_space<vmem>>, %arg4: memref<1x128xf32, #tpu.memory_space<vmem>>, %arg5: memref<128x128xf32, #tpu.memory_space<vmem>>, %arg6: memref<1x128xf32, #tpu.memory_space<vmem>>, %arg7: memref<128x128xf32, #tpu.memory_space<vmem>>, %arg8: memref<1x128xf32, #tpu.memory_space<vmem>>, %arg9: memref<128x128xf32, #tpu.memory_space<vmem>>, %arg10: memref<1x128xf32, #tpu.memory_space<vmem>>, %arg11: memref<128x128xf32, #tpu.memory_space<vmem>>, %arg12: memref<1x128xf32, #tpu.memory_space<vmem>>, %arg13: memref<1x128xf32, #tpu.memory_space<vmem>>, %arg14: memref<1x128xf32, #tpu.memory_space<vmem>>, %arg15: memref<128x256xf32, #tpu.memory_space<vmem>>, %arg16: memref<1x256xf32, #tpu.memory_space<vmem>>, %arg17: memref<256x128xf32, #tpu.memory_space<vmem>>, %arg18: memref<1x128xf32, #tpu.memory_space<vmem>>, %arg19: memref<1x8x128xf32, #tpu.memory_space<vmem>>) attributes {dimension_semantics = [#tpu.dimension_semantics<parallel>], iteration_bounds = array<i64: 2>, scalar_prefetch = 0 : i64, scratch_operands = 0 : i64, tpu.core_type = #tpu.core_type<tc>, window_params = [{transform_indices = @transform_0, window_bounds = array<i64: 1, 8, 128>}, {transform_indices = @transform_1, window_bounds = array<i64: 1, 1, 8>}, {pipeline_mode = #tpu.pipeline_mode<synchronous>, transform_indices = @transform_2, window_bounds = array<i64: 1, 128>}, {pipeline_mode = #tpu.pipeline_mode<synchronous>, transform_indices = @transform_3, window_bounds = array<i64: 1, 128>}, {pipeline_mode = #tpu.pipeline_mode<synchronous>, transform_indices = @transform_4, window_bounds = array<i64: 128, 128>}, {pipeline_mode = #tpu.pipeline_mode<synchronous>, transform_indices = @transform_5, window_bounds = array<i64: 1, 128>}, {pipeline_mode = #tpu.pipeline_mode<synchronous>, transform_indices = @transform_6, window_bounds = array<i64: 128, 128>}, {pipeline_mode = #tpu.pipeline_mode<synchronous>, transform_indices = @transform_7, window_bounds = array<i64: 1, 128>}, {pipeline_mode = #tpu.pipeline_mode<synchronous>, transform_indices = @transform_8, window_bounds = array<i64: 128, 128>}, {pipeline_mode = #tpu.pipeline_mode<synchronous>, transform_indices = @transform_9, window_bounds = array<i64: 1, 128>}, {pipeline_mode = #tpu.pipeline_mode<synchronous>, transform_indices = @transform_10, window_bounds = array<i64: 128, 128>}, {pipeline_mode = #tpu.pipeline_mode<synchronous>, transform_indices = @transform_11, window_bounds = array<i64: 1, 128>}, {pipeline_mode = #tpu.pipeline_mode<synchronous>, transform_indices = @transform_12, window_bounds = array<i64: 1, 128>}, {pipeline_mode = #tpu.pipeline_mode<synchronous>, transform_indices = @transform_13, window_bounds = array<i64: 1, 128>}, {pipeline_mode = #tpu.pipeline_mode<synchronous>, transform_indices = @transform_14, window_bounds = array<i64: 128, 256>}, {pipeline_mode = #tpu.pipeline_mode<synchronous>, transform_indices = @transform_15, window_bounds = array<i64: 1, 256>}, {pipeline_mode = #tpu.pipeline_mode<synchronous>, transform_indices = @transform_16, window_bounds = array<i64: 256, 128>}, {pipeline_mode = #tpu.pipeline_mode<synchronous>, transform_indices = @transform_17, window_bounds = array<i64: 1, 128>}, {transform_indices = @transform_18, window_bounds = array<i64: 1, 8, 128>}]} {
    %c0 = arith.constant 0 : index
    %c0_0 = arith.constant 0 : index
    %c0_1 = arith.constant 0 : index
    %0 = vector.load %arg1[%c0, %c0_0, %c0_1] : memref<1x8x128xf32, #tpu.memory_space<vmem>>, vector<1x8x128xf32>
    %1 = vector.shape_cast %0 : vector<1x8x128xf32> to vector<8x128xf32>
    %c0_2 = arith.constant 0 : index
    %c0_3 = arith.constant 0 : index
    %c0_4 = arith.constant 0 : index
    %2 = vector.load %arg2[%c0_2, %c0_3, %c0_4] : memref<1x1x8xf32, #tpu.memory_space<vmem>>, vector<1x1x8xf32>
    %3 = vector.shape_cast %2 : vector<1x1x8xf32> to vector<1x8xf32>
    %c0_5 = arith.constant 0 : index
    %c0_6 = arith.constant 0 : index
    %4 = vector.load %arg3[%c0_5, %c0_6] : memref<1x128xf32, #tpu.memory_space<vmem>>, vector<1x128xf32>
    %c0_7 = arith.constant 0 : index
    %c0_8 = arith.constant 0 : index
    %5 = vector.load %arg4[%c0_7, %c0_8] : memref<1x128xf32, #tpu.memory_space<vmem>>, vector<1x128xf32>
    %cst = arith.constant dense<0.000000e+00> : vector<8xf32>
    %6 = vector.multi_reduction <add>, %1, %cst [1] : vector<8x128xf32> to vector<8xf32>
    %7 = vector.shape_cast %6 : vector<8xf32> to vector<8x1xf32>
    %cst_9 = arith.constant 1.280000e+02 : f32
    %8 = vector.broadcast %cst_9 : f32 to vector<8x1xf32>
    %9 = arith.divf %7, %8 : vector<8x1xf32>
    %10 = vector.broadcast %9 : vector<8x1xf32> to vector<8x128xf32>
    %11 = arith.subf %1, %10 : vector<8x128xf32>
    %12 = arith.mulf %11, %11 : vector<8x128xf32>
    %cst_10 = arith.constant dense<0.000000e+00> : vector<8xf32>
    %13 = vector.multi_reduction <add>, %12, %cst_10 [1] : vector<8x128xf32> to vector<8xf32>
    %14 = vector.shape_cast %13 : vector<8xf32> to vector<8x1xf32>
    %cst_11 = arith.constant 1.270000e+02 : f32
    %15 = vector.broadcast %cst_11 : f32 to vector<8x1xf32>
    %16 = arith.divf %14, %15 : vector<8x1xf32>
    %17 = math.sqrt %16 : vector<8x1xf32>
    %18 = vector.broadcast %4 : vector<1x128xf32> to vector<8x128xf32>
    %19 = arith.mulf %18, %11 : vector<8x128xf32>
    %cst_12 = arith.constant 9.99999997E-7 : f32
    %20 = vector.broadcast %cst_12 : f32 to vector<8x1xf32>
    %21 = arith.addf %17, %20 : vector<8x1xf32>
    %22 = vector.broadcast %21 : vector<8x1xf32> to vector<8x128xf32>
    %23 = arith.divf %19, %22 : vector<8x128xf32>
    %24 = vector.broadcast %5 : vector<1x128xf32> to vector<8x128xf32>
    %25 = arith.addf %23, %24 : vector<8x128xf32>
    %c0_13 = arith.constant 0 : index
    %c0_14 = arith.constant 0 : index
    %26 = vector.load %arg5[%c0_13, %c0_14] : memref<128x128xf32, #tpu.memory_space<vmem>>, vector<128x128xf32>
    %cst_15 = arith.constant dense<0.000000e+00> : vector<8x128xf32>
    %27 = tpu.matmul %25, %26, %cst_15 {dimension_numbers = #tpu.dot_dimension_numbers<[1], [0], [0], [1], [0, 0, 1, 1], [], []>} : vector<8x128xf32>, vector<128x128xf32>, vector<8x128xf32> -> vector<8x128xf32>
    %c0_16 = arith.constant 0 : index
    %c0_17 = arith.constant 0 : index
    %28 = vector.load %arg6[%c0_16, %c0_17] : memref<1x128xf32, #tpu.memory_space<vmem>>, vector<1x128xf32>
    %29 = vector.broadcast %28 : vector<1x128xf32> to vector<8x128xf32>
    %30 = arith.addf %27, %29 : vector<8x128xf32>
    %c0_18 = arith.constant 0 : index
    %c0_19 = arith.constant 0 : index
    %31 = vector.load %arg7[%c0_18, %c0_19] : memref<128x128xf32, #tpu.memory_space<vmem>>, vector<128x128xf32>
    %cst_20 = arith.constant dense<0.000000e+00> : vector<8x128xf32>
    %32 = tpu.matmul %25, %31, %cst_20 {dimension_numbers = #tpu.dot_dimension_numbers<[1], [0], [0], [1], [0, 0, 1, 1], [], []>} : vector<8x128xf32>, vector<128x128xf32>, vector<8x128xf32> -> vector<8x128xf32>
    %c0_21 = arith.constant 0 : index
    %c0_22 = arith.constant 0 : index
    %33 = vector.load %arg8[%c0_21, %c0_22] : memref<1x128xf32, #tpu.memory_space<vmem>>, vector<1x128xf32>
    %34 = vector.broadcast %33 : vector<1x128xf32> to vector<8x128xf32>
    %35 = arith.addf %32, %34 : vector<8x128xf32>
    %c0_23 = arith.constant 0 : index
    %c0_24 = arith.constant 0 : index
    %36 = vector.load %arg9[%c0_23, %c0_24] : memref<128x128xf32, #tpu.memory_space<vmem>>, vector<128x128xf32>
    %cst_25 = arith.constant dense<0.000000e+00> : vector<8x128xf32>
    %37 = tpu.matmul %25, %36, %cst_25 {dimension_numbers = #tpu.dot_dimension_numbers<[1], [0], [0], [1], [0, 0, 1, 1], [], []>} : vector<8x128xf32>, vector<128x128xf32>, vector<8x128xf32> -> vector<8x128xf32>
    %c0_26 = arith.constant 0 : index
    %c0_27 = arith.constant 0 : index
    %38 = vector.load %arg10[%c0_26, %c0_27] : memref<1x128xf32, #tpu.memory_space<vmem>>, vector<1x128xf32>
    %39 = vector.broadcast %38 : vector<1x128xf32> to vector<8x128xf32>
    %40 = arith.addf %37, %39 : vector<8x128xf32>
    %cst_28 = arith.constant 0.000000e+00 : f32
    %41 = vector.broadcast %cst_28 : f32 to vector<8x128xf32>
    %42 = vector.extract_strided_slice %30 {offsets = [0, 0], sizes = [8, 32], strides = [1, 1]} : vector<8x128xf32> to vector<8x32xf32>
    %43 = vector.extract_strided_slice %35 {offsets = [0, 0], sizes = [8, 32], strides = [1, 1]} : vector<8x128xf32> to vector<8x32xf32>
    %44 = vector.extract_strided_slice %40 {offsets = [0, 0], sizes = [8, 32], strides = [1, 1]} : vector<8x128xf32> to vector<8x32xf32>
    %cst_29 = arith.constant dense<0.000000e+00> : vector<8x8xf32>
    %45 = tpu.matmul %42, %43, %cst_29 {dimension_numbers = #tpu.dot_dimension_numbers<[1], [1], [0], [0], [0, 0, 1, 0], [], []>} : vector<8x32xf32>, vector<8x32xf32>, vector<8x8xf32> -> vector<8x8xf32>
    %cst_30 = arith.constant 0.176776692 : f32
    %46 = vector.broadcast %cst_30 : f32 to vector<8x8xf32>
    %47 = arith.mulf %45, %46 : vector<8x8xf32>
    %cst_31 = arith.constant 0.000000e+00 : f32
    %48 = vector.broadcast %cst_31 : f32 to vector<1x8xf32>
    %49 = arith.cmpf ogt, %3, %48 : vector<1x8xf32>
    %cst_32 = arith.constant -1.000000e+09 : f32
    %50 = vector.shape_cast %49 : vector<1x8xi1> to vector<1x8xi1>
    %51 = vector.broadcast %50 : vector<1x8xi1> to vector<8x8xi1>
    %52 = vector.broadcast %cst_32 : f32 to vector<8x8xf32>
    %53 = arith.select %51, %47, %52 : vector<8x8xi1>, vector<8x8xf32>
    %cst_33 = arith.constant dense<0xFF800000> : vector<8xf32>
    %54 = vector.multi_reduction <maximumf>, %53, %cst_33 [1] : vector<8x8xf32> to vector<8xf32>
    %55 = vector.shape_cast %54 : vector<8xf32> to vector<8x1xf32>
    %56 = vector.broadcast %55 : vector<8x1xf32> to vector<8x8xf32>
    %57 = arith.subf %53, %56 : vector<8x8xf32>
    %58 = math.exp %57 : vector<8x8xf32>
    %cst_34 = arith.constant dense<0.000000e+00> : vector<8xf32>
    %59 = vector.multi_reduction <add>, %58, %cst_34 [1] : vector<8x8xf32> to vector<8xf32>
    %60 = vector.shape_cast %59 : vector<8xf32> to vector<8x1xf32>
    %61 = vector.broadcast %60 : vector<8x1xf32> to vector<8x8xf32>
    %62 = arith.divf %58, %61 : vector<8x8xf32>
    %cst_35 = arith.constant dense<0.000000e+00> : vector<8x32xf32>
    %63 = tpu.matmul %62, %44, %cst_35 {dimension_numbers = #tpu.dot_dimension_numbers<[1], [0], [0], [1], [0, 0, 1, 1], [], []>} : vector<8x8xf32>, vector<8x32xf32>, vector<8x32xf32> -> vector<8x32xf32>
    %c0_36 = arith.constant 0 : index
    %c0_37 = arith.constant 0 : index
    %64 = vector.load %arg11[%c0_36, %c0_37] : memref<128x128xf32, #tpu.memory_space<vmem>>, vector<32x128xf32>
    %cst_38 = arith.constant dense<0.000000e+00> : vector<8x128xf32>
    %65 = tpu.matmul %63, %64, %cst_38 {dimension_numbers = #tpu.dot_dimension_numbers<[1], [0], [0], [1], [0, 0, 1, 1], [], []>} : vector<8x32xf32>, vector<32x128xf32>, vector<8x128xf32> -> vector<8x128xf32>
    %66 = arith.addf %41, %65 : vector<8x128xf32>
    %67 = vector.extract_strided_slice %30 {offsets = [0, 32], sizes = [8, 32], strides = [1, 1]} : vector<8x128xf32> to vector<8x32xf32>
    %68 = vector.extract_strided_slice %35 {offsets = [0, 32], sizes = [8, 32], strides = [1, 1]} : vector<8x128xf32> to vector<8x32xf32>
    %69 = vector.extract_strided_slice %40 {offsets = [0, 32], sizes = [8, 32], strides = [1, 1]} : vector<8x128xf32> to vector<8x32xf32>
    %cst_39 = arith.constant dense<0.000000e+00> : vector<8x8xf32>
    %70 = tpu.matmul %67, %68, %cst_39 {dimension_numbers = #tpu.dot_dimension_numbers<[1], [1], [0], [0], [0, 0, 1, 0], [], []>} : vector<8x32xf32>, vector<8x32xf32>, vector<8x8xf32> -> vector<8x8xf32>
    %cst_40 = arith.constant 0.176776692 : f32
    %71 = vector.broadcast %cst_40 : f32 to vector<8x8xf32>
    %72 = arith.mulf %70, %71 : vector<8x8xf32>
    %cst_41 = arith.constant 0.000000e+00 : f32
    %73 = vector.broadcast %cst_41 : f32 to vector<1x8xf32>
    %74 = arith.cmpf ogt, %3, %73 : vector<1x8xf32>
    %cst_42 = arith.constant -1.000000e+09 : f32
    %75 = vector.shape_cast %74 : vector<1x8xi1> to vector<1x8xi1>
    %76 = vector.broadcast %75 : vector<1x8xi1> to vector<8x8xi1>
    %77 = vector.broadcast %cst_42 : f32 to vector<8x8xf32>
    %78 = arith.select %76, %72, %77 : vector<8x8xi1>, vector<8x8xf32>
    %cst_43 = arith.constant dense<0xFF800000> : vector<8xf32>
    %79 = vector.multi_reduction <maximumf>, %78, %cst_43 [1] : vector<8x8xf32> to vector<8xf32>
    %80 = vector.shape_cast %79 : vector<8xf32> to vector<8x1xf32>
    %81 = vector.broadcast %80 : vector<8x1xf32> to vector<8x8xf32>
    %82 = arith.subf %78, %81 : vector<8x8xf32>
    %83 = math.exp %82 : vector<8x8xf32>
    %cst_44 = arith.constant dense<0.000000e+00> : vector<8xf32>
    %84 = vector.multi_reduction <add>, %83, %cst_44 [1] : vector<8x8xf32> to vector<8xf32>
    %85 = vector.shape_cast %84 : vector<8xf32> to vector<8x1xf32>
    %86 = vector.broadcast %85 : vector<8x1xf32> to vector<8x8xf32>
    %87 = arith.divf %83, %86 : vector<8x8xf32>
    %cst_45 = arith.constant dense<0.000000e+00> : vector<8x32xf32>
    %88 = tpu.matmul %87, %69, %cst_45 {dimension_numbers = #tpu.dot_dimension_numbers<[1], [0], [0], [1], [0, 0, 1, 1], [], []>} : vector<8x8xf32>, vector<8x32xf32>, vector<8x32xf32> -> vector<8x32xf32>
    %c32 = arith.constant 32 : index
    %c0_46 = arith.constant 0 : index
    %89 = vector.load %arg11[%c32, %c0_46] : memref<128x128xf32, #tpu.memory_space<vmem>>, vector<32x128xf32>
    %cst_47 = arith.constant dense<0.000000e+00> : vector<8x128xf32>
    %90 = tpu.matmul %88, %89, %cst_47 {dimension_numbers = #tpu.dot_dimension_numbers<[1], [0], [0], [1], [0, 0, 1, 1], [], []>} : vector<8x32xf32>, vector<32x128xf32>, vector<8x128xf32> -> vector<8x128xf32>
    %91 = arith.addf %66, %90 : vector<8x128xf32>
    %92 = vector.extract_strided_slice %30 {offsets = [0, 64], sizes = [8, 32], strides = [1, 1]} : vector<8x128xf32> to vector<8x32xf32>
    %93 = vector.extract_strided_slice %35 {offsets = [0, 64], sizes = [8, 32], strides = [1, 1]} : vector<8x128xf32> to vector<8x32xf32>
    %94 = vector.extract_strided_slice %40 {offsets = [0, 64], sizes = [8, 32], strides = [1, 1]} : vector<8x128xf32> to vector<8x32xf32>
    %cst_48 = arith.constant dense<0.000000e+00> : vector<8x8xf32>
    %95 = tpu.matmul %92, %93, %cst_48 {dimension_numbers = #tpu.dot_dimension_numbers<[1], [1], [0], [0], [0, 0, 1, 0], [], []>} : vector<8x32xf32>, vector<8x32xf32>, vector<8x8xf32> -> vector<8x8xf32>
    %cst_49 = arith.constant 0.176776692 : f32
    %96 = vector.broadcast %cst_49 : f32 to vector<8x8xf32>
    %97 = arith.mulf %95, %96 : vector<8x8xf32>
    %cst_50 = arith.constant 0.000000e+00 : f32
    %98 = vector.broadcast %cst_50 : f32 to vector<1x8xf32>
    %99 = arith.cmpf ogt, %3, %98 : vector<1x8xf32>
    %cst_51 = arith.constant -1.000000e+09 : f32
    %100 = vector.shape_cast %99 : vector<1x8xi1> to vector<1x8xi1>
    %101 = vector.broadcast %100 : vector<1x8xi1> to vector<8x8xi1>
    %102 = vector.broadcast %cst_51 : f32 to vector<8x8xf32>
    %103 = arith.select %101, %97, %102 : vector<8x8xi1>, vector<8x8xf32>
    %cst_52 = arith.constant dense<0xFF800000> : vector<8xf32>
    %104 = vector.multi_reduction <maximumf>, %103, %cst_52 [1] : vector<8x8xf32> to vector<8xf32>
    %105 = vector.shape_cast %104 : vector<8xf32> to vector<8x1xf32>
    %106 = vector.broadcast %105 : vector<8x1xf32> to vector<8x8xf32>
    %107 = arith.subf %103, %106 : vector<8x8xf32>
    %108 = math.exp %107 : vector<8x8xf32>
    %cst_53 = arith.constant dense<0.000000e+00> : vector<8xf32>
    %109 = vector.multi_reduction <add>, %108, %cst_53 [1] : vector<8x8xf32> to vector<8xf32>
    %110 = vector.shape_cast %109 : vector<8xf32> to vector<8x1xf32>
    %111 = vector.broadcast %110 : vector<8x1xf32> to vector<8x8xf32>
    %112 = arith.divf %108, %111 : vector<8x8xf32>
    %cst_54 = arith.constant dense<0.000000e+00> : vector<8x32xf32>
    %113 = tpu.matmul %112, %94, %cst_54 {dimension_numbers = #tpu.dot_dimension_numbers<[1], [0], [0], [1], [0, 0, 1, 1], [], []>} : vector<8x8xf32>, vector<8x32xf32>, vector<8x32xf32> -> vector<8x32xf32>
    %c64 = arith.constant 64 : index
    %c0_55 = arith.constant 0 : index
    %114 = vector.load %arg11[%c64, %c0_55] : memref<128x128xf32, #tpu.memory_space<vmem>>, vector<32x128xf32>
    %cst_56 = arith.constant dense<0.000000e+00> : vector<8x128xf32>
    %115 = tpu.matmul %113, %114, %cst_56 {dimension_numbers = #tpu.dot_dimension_numbers<[1], [0], [0], [1], [0, 0, 1, 1], [], []>} : vector<8x32xf32>, vector<32x128xf32>, vector<8x128xf32> -> vector<8x128xf32>
    %116 = arith.addf %91, %115 : vector<8x128xf32>
    %117 = vector.extract_strided_slice %30 {offsets = [0, 96], sizes = [8, 32], strides = [1, 1]} : vector<8x128xf32> to vector<8x32xf32>
    %118 = vector.extract_strided_slice %35 {offsets = [0, 96], sizes = [8, 32], strides = [1, 1]} : vector<8x128xf32> to vector<8x32xf32>
    %119 = vector.extract_strided_slice %40 {offsets = [0, 96], sizes = [8, 32], strides = [1, 1]} : vector<8x128xf32> to vector<8x32xf32>
    %cst_57 = arith.constant dense<0.000000e+00> : vector<8x8xf32>
    %120 = tpu.matmul %117, %118, %cst_57 {dimension_numbers = #tpu.dot_dimension_numbers<[1], [1], [0], [0], [0, 0, 1, 0], [], []>} : vector<8x32xf32>, vector<8x32xf32>, vector<8x8xf32> -> vector<8x8xf32>
    %cst_58 = arith.constant 0.176776692 : f32
    %121 = vector.broadcast %cst_58 : f32 to vector<8x8xf32>
    %122 = arith.mulf %120, %121 : vector<8x8xf32>
    %cst_59 = arith.constant 0.000000e+00 : f32
    %123 = vector.broadcast %cst_59 : f32 to vector<1x8xf32>
    %124 = arith.cmpf ogt, %3, %123 : vector<1x8xf32>
    %cst_60 = arith.constant -1.000000e+09 : f32
    %125 = vector.shape_cast %124 : vector<1x8xi1> to vector<1x8xi1>
    %126 = vector.broadcast %125 : vector<1x8xi1> to vector<8x8xi1>
    %127 = vector.broadcast %cst_60 : f32 to vector<8x8xf32>
    %128 = arith.select %126, %122, %127 : vector<8x8xi1>, vector<8x8xf32>
    %cst_61 = arith.constant dense<0xFF800000> : vector<8xf32>
    %129 = vector.multi_reduction <maximumf>, %128, %cst_61 [1] : vector<8x8xf32> to vector<8xf32>
    %130 = vector.shape_cast %129 : vector<8xf32> to vector<8x1xf32>
    %131 = vector.broadcast %130 : vector<8x1xf32> to vector<8x8xf32>
    %132 = arith.subf %128, %131 : vector<8x8xf32>
    %133 = math.exp %132 : vector<8x8xf32>
    %cst_62 = arith.constant dense<0.000000e+00> : vector<8xf32>
    %134 = vector.multi_reduction <add>, %133, %cst_62 [1] : vector<8x8xf32> to vector<8xf32>
    %135 = vector.shape_cast %134 : vector<8xf32> to vector<8x1xf32>
    %136 = vector.broadcast %135 : vector<8x1xf32> to vector<8x8xf32>
    %137 = arith.divf %133, %136 : vector<8x8xf32>
    %cst_63 = arith.constant dense<0.000000e+00> : vector<8x32xf32>
    %138 = tpu.matmul %137, %119, %cst_63 {dimension_numbers = #tpu.dot_dimension_numbers<[1], [0], [0], [1], [0, 0, 1, 1], [], []>} : vector<8x8xf32>, vector<8x32xf32>, vector<8x32xf32> -> vector<8x32xf32>
    %c96 = arith.constant 96 : index
    %c0_64 = arith.constant 0 : index
    %139 = vector.load %arg11[%c96, %c0_64] : memref<128x128xf32, #tpu.memory_space<vmem>>, vector<32x128xf32>
    %cst_65 = arith.constant dense<0.000000e+00> : vector<8x128xf32>
    %140 = tpu.matmul %138, %139, %cst_65 {dimension_numbers = #tpu.dot_dimension_numbers<[1], [0], [0], [1], [0, 0, 1, 1], [], []>} : vector<8x32xf32>, vector<32x128xf32>, vector<8x128xf32> -> vector<8x128xf32>
    %141 = arith.addf %116, %140 : vector<8x128xf32>
    %142 = arith.addf %1, %141 : vector<8x128xf32>
    %c0_66 = arith.constant 0 : index
    %c0_67 = arith.constant 0 : index
    %143 = vector.load %arg12[%c0_66, %c0_67] : memref<1x128xf32, #tpu.memory_space<vmem>>, vector<1x128xf32>
    %144 = vector.broadcast %143 : vector<1x128xf32> to vector<8x128xf32>
    %145 = arith.addf %142, %144 : vector<8x128xf32>
    %c0_68 = arith.constant 0 : index
    %c0_69 = arith.constant 0 : index
    %146 = vector.load %arg13[%c0_68, %c0_69] : memref<1x128xf32, #tpu.memory_space<vmem>>, vector<1x128xf32>
    %c0_70 = arith.constant 0 : index
    %c0_71 = arith.constant 0 : index
    %147 = vector.load %arg14[%c0_70, %c0_71] : memref<1x128xf32, #tpu.memory_space<vmem>>, vector<1x128xf32>
    %cst_72 = arith.constant dense<0.000000e+00> : vector<8xf32>
    %148 = vector.multi_reduction <add>, %145, %cst_72 [1] : vector<8x128xf32> to vector<8xf32>
    %149 = vector.shape_cast %148 : vector<8xf32> to vector<8x1xf32>
    %cst_73 = arith.constant 1.280000e+02 : f32
    %150 = vector.broadcast %cst_73 : f32 to vector<8x1xf32>
    %151 = arith.divf %149, %150 : vector<8x1xf32>
    %152 = vector.broadcast %151 : vector<8x1xf32> to vector<8x128xf32>
    %153 = arith.subf %145, %152 : vector<8x128xf32>
    %154 = arith.mulf %153, %153 : vector<8x128xf32>
    %cst_74 = arith.constant dense<0.000000e+00> : vector<8xf32>
    %155 = vector.multi_reduction <add>, %154, %cst_74 [1] : vector<8x128xf32> to vector<8xf32>
    %156 = vector.shape_cast %155 : vector<8xf32> to vector<8x1xf32>
    %cst_75 = arith.constant 1.270000e+02 : f32
    %157 = vector.broadcast %cst_75 : f32 to vector<8x1xf32>
    %158 = arith.divf %156, %157 : vector<8x1xf32>
    %159 = math.sqrt %158 : vector<8x1xf32>
    %160 = vector.broadcast %146 : vector<1x128xf32> to vector<8x128xf32>
    %161 = arith.mulf %160, %153 : vector<8x128xf32>
    %cst_76 = arith.constant 9.99999997E-7 : f32
    %162 = vector.broadcast %cst_76 : f32 to vector<8x1xf32>
    %163 = arith.addf %159, %162 : vector<8x1xf32>
    %164 = vector.broadcast %163 : vector<8x1xf32> to vector<8x128xf32>
    %165 = arith.divf %161, %164 : vector<8x128xf32>
    %166 = vector.broadcast %147 : vector<1x128xf32> to vector<8x128xf32>
    %167 = arith.addf %165, %166 : vector<8x128xf32>
    %c0_77 = arith.constant 0 : index
    %c0_78 = arith.constant 0 : index
    %168 = vector.load %arg15[%c0_77, %c0_78] : memref<128x256xf32, #tpu.memory_space<vmem>>, vector<128x256xf32>
    %cst_79 = arith.constant dense<0.000000e+00> : vector<8x256xf32>
    %169 = tpu.matmul %167, %168, %cst_79 {dimension_numbers = #tpu.dot_dimension_numbers<[1], [0], [0], [1], [0, 0, 1, 1], [], []>} : vector<8x128xf32>, vector<128x256xf32>, vector<8x256xf32> -> vector<8x256xf32>
    %c0_80 = arith.constant 0 : index
    %c0_81 = arith.constant 0 : index
    %170 = vector.load %arg16[%c0_80, %c0_81] : memref<1x256xf32, #tpu.memory_space<vmem>>, vector<1x256xf32>
    %171 = vector.broadcast %170 : vector<1x256xf32> to vector<8x256xf32>
    %172 = arith.addf %169, %171 : vector<8x256xf32>
    %cst_82 = arith.constant 0.000000e+00 : f32
    %173 = vector.broadcast %cst_82 : f32 to vector<8x256xf32>
    %174 = arith.maximumf %172, %173 : vector<8x256xf32>
    %c0_83 = arith.constant 0 : index
    %c0_84 = arith.constant 0 : index
    %175 = vector.load %arg17[%c0_83, %c0_84] : memref<256x128xf32, #tpu.memory_space<vmem>>, vector<256x128xf32>
    %cst_85 = arith.constant dense<0.000000e+00> : vector<8x128xf32>
    %176 = tpu.matmul %174, %175, %cst_85 {dimension_numbers = #tpu.dot_dimension_numbers<[1], [0], [0], [1], [0, 0, 1, 1], [], []>} : vector<8x256xf32>, vector<256x128xf32>, vector<8x128xf32> -> vector<8x128xf32>
    %c0_86 = arith.constant 0 : index
    %c0_87 = arith.constant 0 : index
    %177 = vector.load %arg18[%c0_86, %c0_87] : memref<1x128xf32, #tpu.memory_space<vmem>>, vector<1x128xf32>
    %178 = vector.broadcast %177 : vector<1x128xf32> to vector<8x128xf32>
    %179 = arith.addf %176, %178 : vector<8x128xf32>
    %180 = arith.addf %145, %179 : vector<8x128xf32>
    %c0_88 = arith.constant 0 : index
    %c0_89 = arith.constant 0 : index
    %c0_90 = arith.constant 0 : index
    %181 = vector.load %arg19[%c0_88, %c0_89, %c0_90] : memref<1x8x128xf32, #tpu.memory_space<vmem>>, vector<1x8x128xf32>
    %182 = vector.shape_cast %181 : vector<1x8x128xf32> to vector<8x128xf32>
    %183 = vector.shape_cast %180 : vector<8x128xf32> to vector<1x8x128xf32>
    tpu.vector_store %arg19[%c0_88, %c0_89, %c0_90], %183 {strides = array<i32>} : memref<1x8x128xf32, #tpu.memory_space<vmem>>, vector<1x8x128xf32>,
    return
  }
  func.func @transform_0(%arg0: i32) -> (i32, i32, i32) {
    %c0_i32 = arith.constant 0 : i32
    %c0_i32_0 = arith.constant 0 : i32
    %c0_i32_1 = arith.constant 0 : i32
    return %arg0, %c0_i32, %c0_i32_0 : i32, i32, i32
  }
  func.func @transform_1(%arg0: i32) -> (i32, i32, i32) {
    %c0_i32 = arith.constant 0 : i32
    %c0_i32_0 = arith.constant 0 : i32
    %c0_i32_1 = arith.constant 0 : i32
    return %arg0, %c0_i32, %c0_i32_0 : i32, i32, i32
  }
  func.func @transform_2(%arg0: i32) -> (i32, i32) {
    %c0_i32 = arith.constant 0 : i32
    %c0_i32_0 = arith.constant 0 : i32
    %c0_i32_1 = arith.constant 0 : i32
    return %c0_i32, %c0_i32_0 : i32, i32
  }
  func.func @transform_3(%arg0: i32) -> (i32, i32) {
    %c0_i32 = arith.constant 0 : i32
    %c0_i32_0 = arith.constant 0 : i32
    %c0_i32_1 = arith.constant 0 : i32
    return %c0_i32, %c0_i32_0 : i32, i32
  }
  func.func @transform_4(%arg0: i32) -> (i32, i32) {
    %c0_i32 = arith.constant 0 : i32
    %c0_i32_0 = arith.constant 0 : i32
    %c0_i32_1 = arith.constant 0 : i32
    return %c0_i32, %c0_i32_0 : i32, i32
  }
  func.func @transform_5(%arg0: i32) -> (i32, i32) {
    %c0_i32 = arith.constant 0 : i32
    %c0_i32_0 = arith.constant 0 : i32
    %c0_i32_1 = arith.constant 0 : i32
    return %c0_i32, %c0_i32_0 : i32, i32
  }
  func.func @transform_6(%arg0: i32) -> (i32, i32) {
    %c0_i32 = arith.constant 0 : i32
    %c0_i32_0 = arith.constant 0 : i32
    %c0_i32_1 = arith.constant 0 : i32
    return %c0_i32, %c0_i32_0 : i32, i32
  }
  func.func @transform_7(%arg0: i32) -> (i32, i32) {
    %c0_i32 = arith.constant 0 : i32
    %c0_i32_0 = arith.constant 0 : i32
    %c0_i32_1 = arith.constant 0 : i32
    return %c0_i32, %c0_i32_0 : i32, i32
  }
  func.func @transform_8(%arg0: i32) -> (i32, i32) {
    %c0_i32 = arith.constant 0 : i32
    %c0_i32_0 = arith.constant 0 : i32
    %c0_i32_1 = arith.constant 0 : i32
    return %c0_i32, %c0_i32_0 : i32, i32
  }
  func.func @transform_9(%arg0: i32) -> (i32, i32) {
    %c0_i32 = arith.constant 0 : i32
    %c0_i32_0 = arith.constant 0 : i32
    %c0_i32_1 = arith.constant 0 : i32
    return %c0_i32, %c0_i32_0 : i32, i32
  }
  func.func @transform_10(%arg0: i32) -> (i32, i32) {
    %c0_i32 = arith.constant 0 : i32
    %c0_i32_0 = arith.constant 0 : i32
    %c0_i32_1 = arith.constant 0 : i32
    return %c0_i32, %c0_i32_0 : i32, i32
  }
  func.func @transform_11(%arg0: i32) -> (i32, i32) {
    %c0_i32 = arith.constant 0 : i32
    %c0_i32_0 = arith.constant 0 : i32
    %c0_i32_1 = arith.constant 0 : i32
    return %c0_i32, %c0_i32_0 : i32, i32
  }
  func.func @transform_12(%arg0: i32) -> (i32, i32) {
    %c0_i32 = arith.constant 0 : i32
    %c0_i32_0 = arith.constant 0 : i32
    %c0_i32_1 = arith.constant 0 : i32
    return %c0_i32, %c0_i32_0 : i32, i32
  }
  func.func @transform_13(%arg0: i32) -> (i32, i32) {
    %c0_i32 = arith.constant 0 : i32
    %c0_i32_0 = arith.constant 0 : i32
    %c0_i32_1 = arith.constant 0 : i32
    return %c0_i32, %c0_i32_0 : i32, i32
  }
  func.func @transform_14(%arg0: i32) -> (i32, i32) {
    %c0_i32 = arith.constant 0 : i32
    %c0_i32_0 = arith.constant 0 : i32
    %c0_i32_1 = arith.constant 0 : i32
    return %c0_i32, %c0_i32_0 : i32, i32
  }
  func.func @transform_15(%arg0: i32) -> (i32, i32) {
    %c0_i32 = arith.constant 0 : i32
    %c0_i32_0 = arith.constant 0 : i32
    %c0_i32_1 = arith.constant 0 : i32
    return %c0_i32, %c0_i32_0 : i32, i32
  }
  func.func @transform_16(%arg0: i32) -> (i32, i32) {
    %c0_i32 = arith.constant 0 : i32
    %c0_i32_0 = arith.constant 0 : i32
    %c0_i32_1 = arith.constant 0 : i32
    return %c0_i32, %c0_i32_0 : i32, i32
  }
  func.func @transform_17(%arg0: i32) -> (i32, i32) {
    %c0_i32 = arith.constant 0 : i32
    %c0_i32_0 = arith.constant 0 : i32
    %c0_i32_1 = arith.constant 0 : i32
    return %c0_i32, %c0_i32_0 : i32, i32
  }
  func.func @transform_18(%arg0: i32) -> (i32, i32, i32) {
    %c0_i32 = arith.constant 0 : i32
    %c0_i32_0 = arith.constant 0 : i32
    %c0_i32_1 = arith.constant 0 : i32
    return %arg0, %c0_i32, %c0_i32_0 : i32, i32, i32
  }
}

</mosaic_0001>

<bundles_post_ra>
// kernel: tpu_custom_call.1
= control target key start
LH: loop header
LB: loop body
LE: loop exit
PB: predicated region body
PF: predicated region fallthrough
CT: control target
= control target key end

     0   :  { %s4005_s0 = inlined_call_operand.hbm [shape: f32[2,8,128], index: 0, kind: input, shape index: {}]   ;;  %s4006_s1 = inlined_call_operand.vmem [shape: f32[2,1,8], index: 1, kind: input, shape index: {}]   ;;  %s4007_s2 = inlined_call_operand.vmem [shape: f32[1,128], index: 2, kind: input, shape index: {}]   ;;  %s4008_s3 = inlined_call_operand.vmem [shape: f32[1,128], index: 3, kind: input, shape index: {}]   ;;  %s4009_s4 = inlined_call_operand.hbm [shape: f32[128,128], index: 4, kind: input, shape index: {}]   ;;  %s4010_s5 = inlined_call_operand.vmem [shape: f32[1,128], index: 5, kind: input, shape index: {}]   ;;  %s4011_s6 = inlined_call_operand.hbm [shape: f32[128,128], index: 6, kind: input, shape index: {}]   ;;  %s4012_s7 = inlined_call_operand.vmem [shape: f32[1,128], index: 7, kind: input, shape index: {}]   ;;  %s4013_s8 = inlined_call_operand.hbm [shape: f32[128,128], index: 8, kind: input, shape index: {}]   ;;  %s4014_s9 = inlined_call_operand.vmem [shape: f32[1,128], index: 9, kind: input, shape index: {}]   ;;  %s4015_s10 = inlined_call_operand.hbm [shape: f32[128,128], index: 10, kind: input, shape index: {}]   ;;  %s4016_s11 = inlined_call_operand.vmem [shape: f32[1,128], index: 11, kind: input, shape index: {}]   ;;  %s4017_s12 = inlined_call_operand.vmem [shape: f32[1,128], index: 12, kind: input, shape index: {}]   ;;  %s4018_s13 = inlined_call_operand.vmem [shape: f32[1,128], index: 13, kind: input, shape index: {}]   ;;  %s4019_s14 = inlined_call_operand.hbm [shape: f32[128,256], index: 14, kind: input, shape index: {}]   ;;  %s4020_s15 = inlined_call_operand.vmem [shape: f32[1,256], index: 15, kind: input, shape index: {}]   ;;  %s4021_s16 = inlined_call_operand.hbm [shape: f32[256,128], index: 16, kind: input, shape index: {}]   ;;  %s4022_s17 = inlined_call_operand.vmem [shape: f32[1,128], index: 17, kind: input, shape index: {}]   ;;  %s4023_s18 = inlined_call_operand.hbm [shape: f32[2,8,128], index: 18, kind: output, shape index: {}]  }
   0x1   :  { %4033 = sst [smem:[#allocation20_spill]] %s4005_s0 }
   0x2   :  { %4034 = sst [smem:[#allocation21_spill]] %s4006_s1 }
   0x3   :  { %4035 = sst [smem:[#allocation22_spill]] %s4007_s2 }
   0x4   :  { %4036 = sst [smem:[#allocation23_spill]] %s4009_s4 }
   0x5   :  { %4037 = sst [smem:[#allocation24_spill]] %s4013_s8 }
   0x6   :  { %4038 = sst [smem:[#allocation25_spill]] %s4014_s9 }
   0x7   :  { %4039 = sst [smem:[#allocation26_spill]] %s4016_s11 }
   0x8   :  { %4040 = sst [smem:[#allocation27_spill]] %s4017_s12 }
   0x9   :  { %4041 = sst [smem:[#allocation28_spill]] %s4018_s13 }
   0xa   :  { %4042 = sst [smem:[#allocation29_spill]] %s4020_s15 }
   0xb   :  { %4043 = sst [smem:[#allocation30_spill]] %s4022_s17 }
   0xc   :  { %4044 = sst [smem:[#allocation31_spill]] %s4023_s18 }
   0xd   :  { %23 = vsyncpa [#allocation3], 0 }
   0xe   :  { %25 = vsyncpa [#allocation3 + $0x1], 0 }
   0xf   :  { %26 = vsyncpa [#allocation6], 0 }
  0x10   :  { %27 = vsyncpa [#allocation9], 0 }
  0x11   :  { %28 = vsyncpa [#allocation12], 0 }
  0x12   :  { %29 = vsyncpa [#allocation4], 0 }
  0x13   :  { %31 = vsyncpa [#allocation4 + $0x1], 0  ;;  %s3467_s27 = smov 0   ;;  %s3469_s28 = smov 0  }
  0x14   :  { %s3471_s29 = smov 0   ;;  %s3473_s30 = smov 0  }
  0x15 LB: > { %s3353_s0 = smov [#allocation5]   ;;  %s3488_s1 = sadd.s32 4294967295, %s3351_s30   ;;  %s3351_s30 = sphi %s3473_s30, %s4081_s30   ;;  %s3347_s29 = sphi %s3471_s29, %s4080_s29   ;;  %s3343_s28 = sphi %s3469_s28, %s4079_s28   ;;  %s3339_s27 = sphi %s3467_s27, %s4078_s27  }
  0x16   : > { %s474_s19 = sshll.u32 %s3353_s0, 4  ;;  %p2414_p0 = scmp.ge.s32.totalorder %s3351_s30, 1  ;;  %s3493_s19 = int_to_ptr.vmem [resolvable:$true] %s474_s19 }
  0x17   : > { %p4030_p1 = scmp.eq.s32.totalorder %s3488_s1, 0  ;;  %p456_p2 = scmp.lt.s32.totalorder %s3351_s30, 3 }
  0x18   : > { %s3354_s21 = smov [#allocation8]   ;;  %s3355_s23 = smov [#allocation11]  }
  0x19   : > { %p3495_p3 = pnand %p2414_p0, %p456_p2  ;;  %s506_s22 = sshll.u32 %s3354_s21, 4  ;;  %s3508_s22 = int_to_ptr.vmem [resolvable:$true] %s506_s22 }
  0x1a   : > { %s544_s24 = sshll.u32 %s3355_s23, 4  ;;  %s4047_s4 = sld [smem:[#allocation23_spill]]  ;;  %s3510_s24 = int_to_ptr.vmem [resolvable:$true] %s544_s24 }
  0x1b   : > { %s4045_s20 = scalar_select %p3495_p3, 1, 0 }
  0x1c   : > { %p2961_p5 = pneg %p3495_p3 }
  0x1e   : > { %p3504_p6 = pnand %p2961_p5, %p4030_p1 }
  0x20   : > { %s3075_s0 = scalar_lea.hbm %s4047_s4, 2048  ;;  %p3520_p8 = pneg %p3504_p6 }
  0x21   : > { %p3076_p7 = scmp.ne.s32.totalorder %s4047_s4, %s3075_s0  ;;  %p3082_p11 = scmp.lt.u32.totalorder %s3075_s0, %s4047_s4 }
  0x23   : > { %p3078_p9 = pnand %p3520_p8, %p3076_p7 }
  0x25   : > { %p3079_p10 = pneg %p3078_p9 }
  0x27   : > { %p3084_p12 = pnand %p3082_p11, %p3079_p10 }
  0x29   : > { %3087 = shalt.err (!%p3084_p12)
}
  0x2a   : > { %s3088_s17 = scalar_lea.vmem %s3493_s19, 2048  ;;  %p3096_p5 = scmp.lt.s32.totalorder %s3493_s19, %s3493_s19 }
  0x2b   : > { %p3089_p13 = scmp.ne.s32.totalorder %s3493_s19, %s3088_s17  ;;  %p3097_p4 = scmp.lt.s32.totalorder %s3088_s17, %s3088_s17 }
  0x2d   : > { %p3091_p0 = pnand %p3089_p13, %p3520_p8  ;;  %p3098_p7 = por %p3097_p4, %p3096_p5 }
  0x2f   : > { %p3092_p2 = pneg %p3091_p0 }
  0x31   : > { %p3099_p9 = pnand %p3098_p7, %p3092_p2 }
  0x33   : > { %3102 = shalt.err (!%p3099_p9)
}
  0x34   : > { %s4026_s18 = smov 128   ;;  %s4028_s15 = smov 8  }
  0x35   : > { %2964 = dma.hbm_to_vmem [thread:$0]  (!%p3504_p6), %s4047_s4, 2048, %s3493_s19, [#allocation6], %s4026_s18, %s4026_s18, %s4028_s15  }
  0x36   : > { %s4049_s8 = sld [smem:[#allocation24_spill]] }
  0x3c   : > { %s3103_s17 = scalar_lea.hbm %s4049_s8, 2048 }
  0x3d   : > { %p3104_p4 = scmp.ne.s32.totalorder %s4049_s8, %s3103_s17  ;;  %p3110_p12 = scmp.lt.u32.totalorder %s3103_s17, %s4049_s8 }
  0x3f   : > { %p3106_p10 = pnand %p3104_p4, %p3520_p8 }
  0x41   : > { %p3107_p11 = pneg %p3106_p10 }
  0x43   : > { %p3112_p13 = pnand %p3110_p12, %p3107_p11 }
  0x45   : > { %3115 = shalt.err (!%p3112_p13)
}
  0x46   : > { %s3116_s19 = scalar_lea.vmem %s3508_s22, 2048  ;;  %p3124_p7 = scmp.lt.s32.totalorder %s3508_s22, %s3508_s22 }
  0x47   : > { %p3117_p0 = scmp.ne.s32.totalorder %s3508_s22, %s3116_s19  ;;  %p3125_p9 = scmp.lt.s32.totalorder %s3116_s19, %s3116_s19 }
  0x49   : > { %p3119_p2 = pnand %p3117_p0, %p3520_p8  ;;  %p3126_p4 = por %p3125_p9, %p3124_p7 }
  0x4b   : > { %p3120_p5 = pneg %p3119_p2 }
  0x4d   : > { %p3127_p10 = pnand %p3126_p4, %p3120_p5 }
  0x4f   : > { %3130 = shalt.err (!%p3127_p10)
}
  0x50   : > { %2970 = dma.hbm_to_vmem [thread:$0]  (!%p3504_p6), %s4049_s8, 2048, %s3508_s22, [#allocation9], %s4026_s18, %s4026_s18, %s4028_s15  }
  0x51   : > { %s3131_s25 = scalar_lea.hbm %s4019_s14, 4096 }
  0x52   : > { %p3132_p11 = scmp.ne.s32.totalorder %s4019_s14, %s3131_s25  ;;  %p3138_p0 = scmp.lt.u32.totalorder %s3131_s25, %s4019_s14 }
  0x54   : > { %p3134_p12 = pnand %p3132_p11, %p3520_p8 }
  0x56   : > { %p3135_p13 = pneg %p3134_p12 }
  0x58   : > { %p3140_p2 = pnand %p3138_p0, %p3135_p13 }
  0x5a   : > { %3143 = shalt.err (!%p3140_p2)
}
  0x5b   : > { %s3144_s22 = scalar_lea.vmem %s3510_s24, 4096  ;;  %p3152_p4 = scmp.lt.s32.totalorder %s3510_s24, %s3510_s24 }
  0x5c   : > { %p3145_p5 = scmp.ne.s32.totalorder %s3510_s24, %s3144_s22  ;;  %p3153_p10 = scmp.lt.s32.totalorder %s3144_s22, %s3144_s22 }
  0x5e   : > { %p3147_p7 = pnand %p3145_p5, %p3520_p8  ;;  %p3154_p11 = por %p3153_p10, %p3152_p4 }
  0x60   : > { %p3148_p9 = pneg %p3147_p7 }
  0x62   : > { %p3155_p12 = pnand %p3154_p11, %p3148_p9 }
  0x64   : > { %3158 = shalt.err (!%p3155_p12)
}
  0x65   : > { %s3358_s19 = smov 256   ;;  %s3359_s9 = smov 16  }
  0x66   : > { %2976 = dma.hbm_to_vmem [thread:$0]  (!%p3504_p6), %s4019_s14, 4096, %s3510_s24, [#allocation12], %s3358_s19, %s3358_s19, %s3359_s9  }
  0x67   : > { %s3360_s13 = smov [#allocation7]   ;;  %s3361_s26 = smov [#allocation10]  }
  0x68   : > { %s490_s25 = sshll.u32 %s3360_s13, 4  ;;  %s522_s0 = sshll.u32 %s3361_s26, 4  ;;  %s491_s25 = int_to_ptr.vmem [resolvable:$true] %s490_s25  ;;  %s523_s0 = int_to_ptr.vmem [resolvable:$true] %s522_s0 }
  0x69   : > { %s3159_s22 = scalar_lea.hbm %s4011_s6, 2048 }
  0x6a   : > { %p3160_p13 = scmp.ne.s32.totalorder %s4011_s6, %s3159_s22  ;;  %p3166_p5 = scmp.lt.u32.totalorder %s3159_s22, %s4011_s6 }
  0x6c   : > { %p3162_p0 = pnand %p3160_p13, %p3520_p8 }
  0x6e   : > { %p3163_p2 = pneg %p3162_p0 }
  0x70   : > { %p3168_p7 = pnand %p3166_p5, %p3163_p2 }
  0x72   : > { %3171 = shalt.err (!%p3168_p7)
}
  0x73   : > { %s3172_s24 = scalar_lea.vmem %s491_s25, 2048  ;;  %p3180_p11 = scmp.lt.s32.totalorder %s491_s25, %s491_s25 }
  0x74   : > { %p3173_p9 = scmp.ne.s32.totalorder %s491_s25, %s3172_s24  ;;  %p3181_p12 = scmp.lt.s32.totalorder %s3172_s24, %s3172_s24 }
  0x76   : > { %p3175_p4 = pnand %p3173_p9, %p3520_p8  ;;  %p3182_p1 = por %p3181_p12, %p3180_p11 }
  0x78   : > { %p3176_p10 = pneg %p3175_p4 }
  0x7a   : > { %p3183_p3 = pnand %p3182_p1, %p3176_p10 }
  0x7c   : > { %3186 = shalt.err (!%p3183_p3)
}
  0x7d   : > { %s4050_s18 = smov 8   ;;  %s4051_s15 = smov 128  }
  0x7e   : > { %2967 = dma.hbm_to_vmem [thread:$0]  (!%p3504_p6), %s4011_s6, 2048, %s491_s25, [#allocation6], %s4051_s15, %s4051_s15, %s4050_s18  }
  0x7f   : > { %s3187_s11 = scalar_lea.hbm %s4015_s10, 2048 }
  0x80   : > { %p3188_p1 = scmp.ne.s32.totalorder %s4015_s10, %s3187_s11  ;;  %p3194_p0 = scmp.lt.u32.totalorder %s3187_s11, %s4015_s10 }
  0x82   : > { %p3190_p3 = pnand %p3188_p1, %p3520_p8 }
  0x84   : > { %p3191_p13 = pneg %p3190_p3 }
  0x86   : > { %p3196_p2 = pnand %p3194_p0, %p3191_p13 }
  0x88   : > { %3199 = shalt.err (!%p3196_p2)
}
  0x89   : > { %s3200_s17 = scalar_lea.vmem %s523_s0, 2048  ;;  %p3208_p4 = scmp.lt.s32.totalorder %s523_s0, %s523_s0 }
  0x8a   : > { %p3201_p5 = scmp.ne.s32.totalorder %s523_s0, %s3200_s17  ;;  %p3209_p10 = scmp.lt.s32.totalorder %s3200_s17, %s3200_s17 }
  0x8c   : > { %p3203_p7 = pnand %p3201_p5, %p3520_p8  ;;  %p3210_p11 = por %p3209_p10, %p3208_p4 }
  0x8e   : > { %p3204_p9 = pneg %p3203_p7 }
  0x90   : > { %p3211_p12 = pnand %p3210_p11, %p3204_p9 }
  0x92   : > { %3214 = shalt.err (!%p3211_p12)
}
  0x93   : > { %2973 = dma.hbm_to_vmem [thread:$0]  (!%p3504_p6), %s4015_s10, 2048, %s523_s0, [#allocation9], %s4051_s15, %s4051_s15, %s4050_s18  }
  0x94   : > { %s3362_s24 = smov [#allocation13]   ;;  %s3215_s9 = scalar_lea.hbm %s4021_s16, 4096 }
  0x95   : > { %s560_s4 = sshll.u32 %s3362_s24, 4  ;;  %p3216_p1 = scmp.ne.s32.totalorder %s4021_s16, %s3215_s9  ;;  %s561_s4 = int_to_ptr.vmem [resolvable:$true] %s560_s4 }
  0x96   : > { %p3222_p0 = scmp.lt.u32.totalorder %s3215_s9, %s4021_s16 }
  0x97   : > { %p3218_p3 = pnand %p3216_p1, %p3520_p8 }
  0x99   : > { %p3219_p13 = pneg %p3218_p3 }
  0x9b   : > { %p3224_p2 = pnand %p3222_p0, %p3219_p13 }
  0x9d   : > { %3227 = shalt.err (!%p3224_p2)
}
  0x9e   : > { %s3228_s0 = scalar_lea.vmem %s561_s4, 4096  ;;  %p3236_p4 = scmp.lt.s32.totalorder %s561_s4, %s561_s4 }
  0x9f   : > { %p3229_p5 = scmp.ne.s32.totalorder %s561_s4, %s3228_s0  ;;  %p3237_p10 = scmp.lt.s32.totalorder %s3228_s0, %s3228_s0 }
  0xa1   : > { %p3231_p7 = pnand %p3229_p5, %p3520_p8  ;;  %p3238_p11 = por %p3237_p10, %p3236_p4 }
  0xa3   : > { %p3232_p9 = pneg %p3231_p7 }
  0xa5   : > { %p3239_p12 = pnand %p3238_p11, %p3232_p9 }
  0xa7   : > { %3242 = shalt.err (!%p3239_p12)
}
  0xa8   : > { %2979 = dma.hbm_to_vmem [thread:$0]  (!%p3504_p6), %s4021_s16, 4096, %s561_s4, [#allocation12], %s4051_s15, %s4051_s15, %s4050_s18  }
  0xa9   : > { %s2413_s2 = sadd.s32 4294967294, %s3351_s30   ;;  %s3658_s21 = sadd.s32 1, %s3351_s30  }
  0xaa   : > { %s41_s25 = ssub.s32 %s3351_s30, %s3658_s21  ;;  %s44_s22 = sadd.s32 1, %s3347_s29 }
  0xab   : > { %p42_p8 = scmp.eq.s32.totalorder %s41_s25, 0  ;;  %p51_p1 = scmp.ne.s32.totalorder %s3347_s29, %s3343_s28 }
  0xac   : > { %p52_p3 = scmp.eq.s32.totalorder %s3351_s30, 0  ;;  %p57_p13 = scmp.ne.s32.totalorder %s3343_s28, %s3339_s27 }
  0xad   : > { %s3669_s24 = scalar_select %p42_p8, %s3347_s29, %s44_s22  }
  0xae   : > { %p3671_p0 = por %p52_p3, %p51_p1  ;;  %p4053_p2 = scmp.eq.s32.totalorder %s3488_s1, 0 }
  0xaf   : > { %p443_p5 = scmp.eq.s32.totalorder %s3488_s1, 1  ;;  %p449_p7 = scmp.eq.s32.totalorder %s2413_s2, 1 }
  0xb0   : > { %p3677_p6 = por %p4053_p2, %p57_p13  ;;  %p2994_p9 = scmp.lt.s32.totalorder %s3351_s30, 2 }
  0xb1   : > { %s577_s15 = sand.u32 1, %s3347_s29   ;;  %p3684_p4 = por %p443_p5, %p51_p1 }
  0xb2   : > { %p3688_p10 = por %p449_p7, %p57_p13  ;;  %s2422_s9 = sshll.u32 %s577_s15, 3 }
  0xb3   : > { %s4055_s4 = scalar_select %p3684_p4, 1, 0 }
  0xb4   : > { %s4056_s19 = scalar_select %p3688_p10, 1, 0 }
  0xb5   : > { %s2423_s11 = sshll.u32 %s3351_s30, 7  ;;  %s4057_s26 = sld [smem:[#allocation20_spill]] }
  0xb6   : > { %s581_s23 = scalar_lea.vmem [#allocation2], %s2422_s9  ;;  %p3702_p11 = pnand %p2994_p9, %p3671_p0 }
  0xb7   : > { %s588_s17 = sshll.u32 %s581_s23, 4  ;;  %s578_s25 = scalar_lea.sflag [#allocation3], %s577_s15  ;;  %s3698_s17 = int_to_ptr.vmem [resolvable:$true] %s588_s17 }
  0xb8   : > { %p3245_p8 = pneg %p3702_p11 }
  0xbb   : > { %s3696_s0 = scalar_lea.hbm %s4057_s26, %s2423_s11  ;;  %s3248_s12 = scalar_lea.hbm %s4057_s26, 256 }
  0xbc   : > { %s3243_s22 = scalar_lea.hbm %s3696_s0, 128  ;;  %p3249_p13 = scmp.lt.u32.totalorder %s3696_s0, %s4057_s26 }
  0xbd   : > { %p3244_p12 = scmp.ne.s32.totalorder %s3696_s0, %s3243_s22  ;;  %p3250_p0 = scmp.lt.u32.totalorder %s3248_s12, %s3243_s22 }
  0xbe   : > { %p3252_p5 = scmp.lt.u32.totalorder %s3243_s22, %s3696_s0 }
  0xbf   : > { %p3246_p1 = pnand %p3245_p8, %p3244_p12  ;;  %p3251_p2 = por %p3250_p0, %p3249_p13 }
  0xc1   : > { %p3247_p3 = pneg %p3246_p1  ;;  %p3253_p7 = por %p3252_p5, %p3251_p2 }
  0xc3   : > { %p3254_p9 = pnand %p3253_p7, %p3247_p3 }
  0xc5   : > { %3257 = shalt.err (!%p3254_p9)
}
  0xc6   : > { %s3258_s15 = scalar_lea.vmem %s3698_s17, 128  ;;  %s3363_s23 = smov [#allocation2]  }
  0xc7   : > { %p3259_p12 = scmp.ne.s32.totalorder %s3698_s17, %s3258_s15  ;;  %s3263_s9 = sshll.u32 %s3363_s23, 4  ;;  %s3264_s9 = int_to_ptr.vmem [resolvable:$false] %s3263_s9 }
  0xc8   : > { %s3265_s11 = scalar_lea.vmem %s3264_s9, 256  ;;  %p3266_p4 = scmp.lt.s32.totalorder %s3698_s17, %s3264_s9 }
  0xc9   : > { %p3261_p1 = pnand %p3259_p12, %p3245_p8  ;;  %p3267_p13 = scmp.lt.s32.totalorder %s3265_s11, %s3258_s15 }
  0xcb   : > { %p3262_p10 = pneg %p3261_p1  ;;  %p3268_p0 = por %p3267_p13, %p3266_p4 }
  0xcd   : > { %p3269_p2 = pnand %p3268_p0, %p3262_p10 }
  0xcf   : > { %3272 = shalt.err (!%p3269_p2)
}
  0xd0   : > { %2983 = dma.hbm_to_vmem [thread:$0]  (!%p3702_p11), %s3696_s0, 128, %s3698_s17, %s578_s25  }
  0xd1   : > { %p4059_p3 = scmp.ne.s32.totalorder %s4045_s20, 0 }
  0xd2   : > { %s3734_s22 = sand.u32 (!%p4059_p3), 1, %s3343_s28  }
  0xd3   : > { %603 = sbr.rel (%p4059_p3) target bundleno = 4328 (0x10e8), region = 92  ;;  %s2425_s12 = sshll.u32 (!%p4059_p3), %s3734_s22, 3 }
  0xd4   : > { %s606_s8 = scalar_lea.sflag (!%p4059_p3), [#allocation3], %s3734_s22  ;;  %s609_s13 = scalar_lea.vmem (!%p4059_p3), [#allocation2], %s2425_s12 }
  0xda   : > { %3318 = dma.done.wait (%p3677_p6), %s606_s8, 128  }
  0xdb   : > { %3320 = vsyncadd (%p3677_p6), %s606_s8, 4294967168  ;;  %p4060_p4 = scmp.eq.s32.totalorder %s3488_s1, 0 }
  0xdd   : > { %3322 = dma.done.wait (%p4060_p4), [#allocation6], 4096   ;;  %p4061_p10 = pmov %p4060_p4 }
  0xde   : > { %p4062_p11 = pmov %p4060_p4 }
  0xdf   : > { %3324 = vsyncadd (%p4061_p10), [#allocation6], 4294963200 }
  0xe0   : > { %3326 = dma.done.wait (%p4062_p11), [#allocation9], 4096   ;;  %p4063_p8 = pmov %p4060_p4 }
  0xe1   : > { %p4064_p5 = pmov %p4060_p4 }
  0xe2   : > { %3328 = vsyncadd (%p4063_p8), [#allocation9], 4294963200 }
  0xe3   : > { %3330 = dma.done.wait (%p4064_p5), [#allocation12], 8192   ;;  %p4065_p7 = pmov %p4060_p4 }
  0xe4   : > { %v3756_v0 = vld [vmem:[%s609_s13] sm:$0xff]  ;;  %v730_v5 = vld [vmem:[#allocation5] sm:$0xff]  ;;  %v731_v6 = vld [vmem:[#allocation5 + $0x8] sm:$0xff]  ;;  %v3364_v10 = vmov 0.0|0.0   ;;  %vm3365_vm0 = vmmov 0   ;;  %v3366_v37 = vmov 0.0  }
  0xe5   : > { %3332 = vsyncadd (%p4065_p7), [#allocation12], 4294959104  ;;  %696 = vadd.xlane.f32.xlu0 %v3756_v0  ;;  %v2774_v7 = vpack.c.bf16 %v731_v6, %v730_v5  ;;  %v823_v8 = vld [vmem:[#allocation7] sm:$0xff]  ;;  %v824_v9 = vld [vmem:[#allocation7 + $0x8] sm:$0xff]  ;;  %2773 = vmatprep.subr.bf16.mxu0 %v3364_v10  ;;  %s4066_s0 = sld [smem:[#allocation22_spill]]  ;;  %vm1009_vm3 = vcmask 261120  }
  0xe6   : > { %2797 = vmatprep.subr.bf16.mxu1 %v3364_v10  ;;  %v2798_v11 = vpack.c.bf16 %v824_v9, %v823_v8  ;;  %v732_v12 = vld [vmem:[#allocation5 + $0x10] sm:$0xff]  ;;  %v733_v13 = vld [vmem:[#allocation5 + $0x18] sm:$0xff]  ;;  %v734_v18 = vld [vmem:[#allocation5 + $0x20] sm:$0xff]  ;;  %2616 = vmatprep.mubr.msk.f32.mxu0 %vm3365_vm0, %v3366_v37  ;;  %s3367_s11 = smov 96   ;;  %s4067_s20 = sld [smem:[#allocation25_spill]]  ;;  %vm1095_vm6 = vcmask 64512  }
  0xe7   : > { %2775 = vmatpush3.bf16.msra.mxu0 %v2774_v7  ;;  %v2777_v14 = vpack.c.bf16 %v733_v13, %v732_v12  ;;  %v825_v15 = vld [vmem:[#allocation7 + $0x10] sm:$0xff]  ;;  %v826_v16 = vld [vmem:[#allocation7 + $0x18] sm:$0xff]  ;;  %v735_v19 = vld [vmem:[#allocation5 + $0x28] sm:$0xff]  ;;  %2651 = vmatprep.mubr.msk.f32.mxu1 %vm3365_vm0, %v3366_v37  ;;  %p689_p6 = scmp.lt.s32.totalorder %s3488_s1, 1  ;;  %s4068_s2 = sld [smem:[#allocation21_spill]] }
  0xe8   : > { %2799 = vmatpush3.bf16.msra.mxu1 %v2798_v11  ;;  %2776 = vmatprep.subr.bf16.mxu0 %v3364_v10  ;;  %v2801_v17 = vpack.c.bf16 %v826_v16, %v825_v15  ;;  %v2780_v20 = vpack.c.bf16 %v735_v19, %v734_v18  ;;  %v827_v21 = vld [vmem:[#allocation7 + $0x20] sm:$0xff]  ;;  %v828_v22 = vld [vmem:[#allocation7 + $0x28] sm:$0xff]  ;;  %v736_v24 = vld [vmem:[#allocation5 + $0x30] sm:$0xff]  ;;  %s3369_s15 = smov 64   ;;  %s3370_s23 = smov 32  }
  0xe9   : > { %2800 = vmatprep.subr.bf16.mxu1 %v3364_v10  ;;  %v2804_v23 = vpack.c.bf16 %v828_v22, %v827_v21  ;;  %v737_v25 = vld [vmem:[#allocation5 + $0x38] sm:$0xff]  ;;  %v829_v27 = vld [vmem:[#allocation7 + $0x30] sm:$0xff]  ;;  %v738_v30 = vld [vmem:[#allocation5 + $0x40] sm:$0xff]  ;;  %s690_s18 = scalar_select %p689_p6, %s3488_s1, 1 }
  0xea   : > { %v2783_v26 = vpack.c.bf16 %v737_v25, %v736_v24  ;;  %v830_v28 = vld [vmem:[#allocation7 + $0x38] sm:$0xff]  ;;  %v739_v31 = vld [vmem:[#allocation5 + $0x48] sm:$0xff]  ;;  %v831_v32 = vld [vmem:[#allocation7 + $0x40] sm:$0xff]  ;;  %s4069_s8 = sld [smem:[#allocation26_spill]]  ;;  %s2459_s13 = sshll.u32 %s3488_s1, 7 }
  0xeb   : > { %2778 = vmatpush3.bf16.msra.mxu0 %v2777_v14  ;;  %v2807_v29 = vpack.c.bf16 %v830_v28, %v829_v27  ;;  %v2786_v33 = vpack.c.bf16 %v739_v31, %v738_v30  ;;  %v832_v34 = vld [vmem:[#allocation7 + $0x48] sm:$0xff]  ;;  %v740_v35 = vld [vmem:[#allocation5 + $0x50] sm:$0xff]  ;;  %v741_v36 = vld [vmem:[#allocation5 + $0x58] sm:$0xff]  ;;  %p4075_p12 = scmp.ne.s32.totalorder %s4055_s4, 0  ;;  %s3371_s1 = smov [#allocation14]  }
  0xec   : > { %2802 = vmatpush3.bf16.msra.mxu1 %v2801_v17  ;;  %2779 = vmatprep.subr.bf16.mxu0 %v3364_v10  ;;  %v2810_v38 = vpack.c.bf16 %v832_v34, %v831_v32  ;;  %v833_v39 = vld [vmem:[#allocation7 + $0x50] sm:$0xff]  ;;  %v834_v40 = vld [vmem:[#allocation7 + $0x58] sm:$0xff]  ;;  %v2789_v41 = vpack.c.bf16 %v741_v36, %v740_v35  ;;  %v742_v43 = vld [vmem:[#allocation5 + $0x60] sm:$0xff] }
  0xed   : > { %2803 = vmatprep.subr.bf16.mxu1 %v3364_v10  ;;  %v2813_v42 = vpack.c.bf16 %v834_v40, %v833_v39  ;;  %v743_v44 = vld [vmem:[#allocation5 + $0x68] sm:$0xff]  ;;  %v835_v45 = vld [vmem:[#allocation7 + $0x60] sm:$0xff]  ;;  %v744_v49 = vld [vmem:[#allocation5 + $0x70] sm:$0xff]  ;;  %s691_s25 = scalar_lea.vmem %s4068_s2, %s690_s18  ;;  %s4070_s18 = sld [smem:[#allocation27_spill]] }
  0xee   : > { %v836_v46 = vld [vmem:[#allocation7 + $0x68] sm:$0xff]  ;;  %v2792_v47 = vpack.c.bf16 %v743_v44, %v742_v43  ;;  %v745_v50 = vld [vmem:[#allocation5 + $0x78] sm:$0xff]  ;;  %v837_v51 = vld [vmem:[#allocation7 + $0x70] sm:$0xff]  ;;  %v1089_v44 = vlaneseq  ;;  %s4071_s2 = sld [smem:[#allocation28_spill]] }
  0xef   : > { %2781 = vmatpush3.bf16.msra.mxu0 %v2780_v20  ;;  %v2816_v48 = vpack.c.bf16 %v836_v46, %v835_v45  ;;  %v838_v52 = vld [vmem:[#allocation7 + $0x78] sm:$0xff]  ;;  %v2795_v53 = vpack.c.bf16 %v745_v50, %v744_v49  ;;  %v2433_v63 = vld [vmem:[%s4066_s0] ss:$0 sm:$0xff]  ;;  %v921_v14 = vld [vmem:[#allocation8 + $0x28] sm:$0xff] }
  0xf0   : > { %2805 = vmatpush3.bf16.msra.mxu1 %v2804_v23  ;;  %2782 = vmatprep.subr.bf16.mxu0 %v3364_v10  ;;  %v2819_v54 = vpack.c.bf16 %v838_v52, %v837_v51  ;;  %v2434_v6 = vld [vmem:[%s4008_s3] ss:$0 sm:$0xff]  ;;  %v919_v12 = vld [vmem:[#allocation8 + $0x18] sm:$0xff]  ;;  %v924_v19 = vld [vmem:[#allocation8 + $0x40] sm:$0xff]  ;;  %v3838_v46 = vshrl.u32 %v1089_v44, 7 }
  0xf1   : > { %2806 = vmatprep.subr.bf16.mxu1 %v3364_v10  ;;  %v918_v11 = vld [vmem:[#allocation8 + $0x10] sm:$0xff]  ;;  %v923_v17 = vld [vmem:[#allocation8 + $0x38] sm:$0xff]  ;;  %v925_v20 = vld [vmem:[#allocation8 + $0x48] sm:$0xff] }
  0xf2   : > { %v2825_v13 = vpack.c.bf16 %v919_v12, %v918_v11  ;;  %v922_v16 = vld [vmem:[#allocation8 + $0x30] sm:$0xff]  ;;  %v2834_v21 = vpack.c.bf16 %v925_v20, %v924_v19  ;;  %v927_v23 = vld [vmem:[#allocation8 + $0x58] sm:$0xff]  ;;  %v928_v25 = vld [vmem:[#allocation8 + $0x60] sm:$0xff] }
  0xf3   : > { %2784 = vmatpush3.bf16.msra.mxu0 %v2783_v26  ;;  %v2831_v18 = vpack.c.bf16 %v923_v17, %v922_v16  ;;  %v926_v22 = vld [vmem:[#allocation8 + $0x50] sm:$0xff]  ;;  %v929_v26 = vld [vmem:[#allocation8 + $0x68] sm:$0xff] }
  0xf4   : > { %2808 = vmatpush3.bf16.msra.mxu1 %v2807_v29  ;;  %2785 = vmatprep.subr.bf16.mxu0 %v3364_v10  ;;  %v2837_v24 = vpack.c.bf16 %v927_v23, %v926_v22  ;;  %v2840_v27 = vpack.c.bf16 %v929_v26, %v928_v25  ;;  %v930_v28 = vld [vmem:[#allocation8 + $0x70] sm:$0xff]  ;;  %v931_v29 = vld [vmem:[#allocation8 + $0x78] sm:$0xff]  ;;  %v1353_v19 = vld [vmem:[#allocation10 + $0x28] sm:$0xff] }
  0xf5   : > { %2809 = vmatprep.subr.bf16.mxu1 %v3364_v10  ;;  %v2843_v30 = vpack.c.bf16 %v931_v29, %v930_v28  ;;  %v2436_v31 = vld [vmem:[%s4012_s7] ss:$0 sm:$0xff]  ;;  %v1180_v26 = vld [vmem:[#allocation10] sm:$0xff] }
  0xf6   : > { %v2435_v34 = vld [vmem:[%s4010_s5] ss:$0 sm:$0xff] }
  0xf7   : > { %2787 = vmatpush3.bf16.msra.mxu0 %v2786_v33  ;;  %v2437_v40 = vld [vmem:[%s4067_s20] ss:$0 sm:$0xff]  ;;  %s688_s20 = scalar_lea.vmem [#allocation14], %s2425_s12  ;;  %s3277_s12 = sshll.u32 %s3371_s1, 4  ;;  %s3278_s12 = int_to_ptr.vmem [resolvable:$false] %s3277_s12 }
  0xf8   : > { %2811 = vmatpush3.bf16.msra.mxu1 %v2810_v38  ;;  %2788 = vmatprep.subr.bf16.mxu0 %v3364_v10  ;;  %v693_v45 = vld [vmem:[%s691_s25] sm:$0x1]  ;;  %s3279_s9 = scalar_lea.vmem %s3278_s12, 256 }
  0xf9   : > { %2812 = vmatprep.subr.bf16.mxu1 %v3364_v10  ;;  %vm1087_vm4 = vcmp.gt.f32.partialorder %v693_v45, 0.0  ;;  %v1354_v23 = vld [vmem:[#allocation10 + $0x30] sm:$0xff] }
  0xfa   : > { %v1182_v29 = vld [vmem:[#allocation10 + $0x10] sm:$0xff] }
  0xfb   : > { %2790 = vmatpush3.bf16.msra.mxu0 %v2789_v41 }
  0xfc   : > { %2814 = vmatpush3.bf16.msra.mxu1 %v2813_v42  ;;  %2791 = vmatprep.subr.bf16.mxu0 %v3364_v10 }
  0xfd   : > { %2815 = vmatprep.subr.bf16.mxu1 %v3364_v10 }
  0xff   : > { %2793 = vmatpush3.bf16.msra.mxu0 %v2792_v47  ;;  %v1091_v47 = vsub.s32 0, %v3838_v46 }
 0x100   : > { %2817 = vmatpush3.bf16.msra.mxu1 %v2816_v48  ;;  %2794 = vmatprep.subr.bf16.mxu0 %v3364_v10  ;;  %v3368_v48 = vmov 0  }
 0x101   : > { %2818 = vmatprep.subr.bf16.mxu1 %v3364_v10  ;;  %v1088_v49 = vsel %vm1087_vm4, 1, %v3368_v48 }
 0x102   : > { %v3843_v50 = vrot.slane %v1088_v49, %v1091_v47 }
 0x103   : > { %2796 = vmatpush3.bf16.msra.mxu0 %v2795_v53 }
 0x104   : > { %2820 = vmatpush3.bf16.msra.mxu1 %v2819_v54  ;;  %2821 = vmatprep.subr.bf16.mxu0 %v3364_v10  ;;  %vm1093_vm5 = vcmp.eq.s32.totalorder %v3843_v50, 1  ;;  %v1916_v50 = vld [vmem:[#allocation10 + $0x70] sm:$0xff] }
 0x105   : > { %2689 = vmatprep.subr.mxu1 %v3366_v37 }
 0x172   : > { %v697_v1 = vpop.xlane.xlu0 %696 }
 0x173   : > { %v699_v2 = vmul.f32 0.0078125, %v697_v1 }
 0x175   : > { %v3760_v3 = vsub.f32 %v3756_v0, %v699_v2  ;;  %v916_v2 = vld [vmem:[#allocation8] sm:$0xff] }
 0x177   : > { %v701_v4 = vmul.f32 %v3760_v3, %v3760_v3  ;;  %v719_v1 = vmul.f32 %v2433_v63, %v3760_v3  ;;  %v920_v3 = vld [vmem:[#allocation8 + $0x20] sm:$0xff] }
 0x178   : > { %v2828_v15 = vpack.c.bf16 %v921_v14, %v920_v3 }
 0x179   : > { %702 = vadd.xlane.f32.xlu0 %v701_v4  ;;  %v917_v4 = vld [vmem:[#allocation8 + $0x8] sm:$0xff] }
 0x17a   : > { %v2822_v8 = vpack.c.bf16 %v917_v4, %v916_v2 }
 0x206   : > { %v703_v55 = vpop.xlane.xlu0 %702 }
 0x207   : > { %v705_v56 = vmul.f32 0.007874016, %v703_v55 }
 0x209   : > { %3051 = vrsqrt.f32 %v705_v56  ;;  %vm708_vm1 = vcmp.eq.f32.partialorder %v705_v56, inf  ;;  %v711_v59 = vand.u32 2147483648, %v705_v56  ;;  %vm710_vm2 = vcmp.eq.f32.partialorder %v705_v56, 0.0 }
 0x213   : > { %v3052_v57 = vpop.eup %3051 }
 0x214   : > { %v707_v58 = vmul.f32 %v3052_v57, %v705_v56 }
 0x216   : > { %v709_v60 = vsel %vm708_vm1, %v705_v56, %v707_v58 }
 0x217   : > { %v712_v61 = vsel %vm710_vm2, %v711_v59, %v709_v60 }
 0x218   : > { %v720_v62 = vadd.f32 1e-06, %v712_v61 }
 0x21a   : > { %3053 = vrcp.f32 %v720_v62 }
 0x224   : > { %v3054_v5 = vpop.eup %3053 }
 0x225   : > { %v722_v7 = vmul.f32 %v3054_v5, %v719_v1 }
 0x227   : > { %v729_v9 = vadd.f32 %v2434_v6, %v722_v7 }
 0x229   : > { %2617 = vmatmul.mubr.f32.vlgmr.msra.gmra.mrb[0].mxu0 %v729_v9  ;;  %2652 = vmatmul.mubr.f32.vlgmr.msra.gmra.mrb[0].mxu1 %v729_v9 }
 0x22a   : > { %2823 = vmatpush3.bf16.msra.mxu0 %v2822_v8  ;;  %2686 = vmatprep.mubr.msk.f32.mxu0 %vm3365_vm0, %v3366_v37 }
 0x22b   : > { %2824 = vmatprep.subr.bf16.mxu0 %v3364_v10  ;;  %2691 = vmatprep.mubr.msk.f32.mxu1 %vm3365_vm0, %v3366_v37 }
 0x22e   : > { %2826 = vmatpush3.bf16.msra.mxu0 %v2825_v13 }
 0x22f   : > { %2827 = vmatprep.subr.bf16.mxu0 %v3364_v10 }
 0x232   : > { %2829 = vmatpush3.bf16.msra.mxu0 %v2828_v15 }
 0x233   : > { %2830 = vmatprep.subr.bf16.mxu0 %v3364_v10 }
 0x236   : > { %2832 = vmatpush3.bf16.msra.mxu0 %v2831_v18  ;;  %v1352_v18 = vld [vmem:[#allocation10 + $0x20] sm:$0xff] }
 0x237   : > { %2833 = vmatprep.subr.bf16.mxu0 %v3364_v10 }
 0x23a   : > { %2835 = vmatpush3.bf16.msra.mxu0 %v2834_v21  ;;  %v2846_v21 = vpack.c.bf16 %v1353_v19, %v1352_v18  ;;  %v1914_v19 = vld [vmem:[#allocation10 + $0x60] sm:$0xff] }
 0x23b   : > { %2836 = vmatprep.subr.bf16.mxu0 %v3364_v10 }
 0x23e   : > { %2838 = vmatpush3.bf16.msra.mxu0 %v2837_v24  ;;  %v1355_v24 = vld [vmem:[#allocation10 + $0x38] sm:$0xff] }
 0x23f   : > { %2839 = vmatprep.subr.bf16.mxu0 %v3364_v10  ;;  %v2849_v25 = vpack.c.bf16 %v1355_v24, %v1354_v23 }
 0x242   : > { %2841 = vmatpush3.bf16.msra.mxu0 %v2840_v27  ;;  %v1181_v27 = vld [vmem:[#allocation10 + $0x8] sm:$0xff] }
 0x243   : > { %2842 = vmatprep.subr.bf16.mxu0 %v3364_v10  ;;  %v2852_v28 = vpack.c.bf16 %v1181_v27, %v1180_v26 }
 0x246   : > { %2844 = vmatpush3.bf16.msra.mxu0 %v2843_v30  ;;  %v1183_v30 = vld [vmem:[#allocation10 + $0x18] sm:$0xff] }
 0x247   : > { %2857 = vmatprep.subr.bf16.mxu0 %v3364_v10 }
 0x249   : > { %2687 = vmatmul.mubr.f32.vlgmr.msra.gmra.mrb[2].mxu0 %v729_v9 }
 0x24a   : > { %2749 = vmatprep.mubr.msk.f32.mxu0 %vm3365_vm0, %v3366_v37 }
 0x2fc   : > { %v819_v32 = vpop.f32.mrb[0].mxu0  ;;  %v912_v33 = vpop.f32.mrb[0].mxu1 }
 0x2fd   : > { %v3813_v35 = vadd.f32 %v2436_v31, %v912_v33  ;;  %v2618_v36 = vpop.f32.mrb[1].mxu0  ;;  %v2653_v38 = vpop.f32.mrb[1].mxu1  ;;  %v3819_v39 = vadd.f32 %v2435_v34, %v819_v32  ;;  %v2855_v33 = vpack.c.bf16 %v1183_v30, %v1182_v29 }
 0x2ff   : > { %1186 = vrot.lane.b32.xlu0 %v3813_v35, %s3367_s11  ;;  %2690 = vmatpush3.xpose.msk.msra.mxu1 %vm1009_vm3, %v3813_v35 }
 0x300   : > { %2694 = vmatprep.subr.mxu1 %v3366_v37 }
 0x302   : > { %2692 = vmatmul.mubr.msk.f32.vlgmr.msra.gmra.mrb[2].mxu1 %vm1009_vm3, %v3819_v39 }
 0x303   : > { %2696 = vmatprep.mubr.msk.f32.mxu1 %vm3365_vm0, %v3366_v37 }
 0x31c   : > { %v1005_v41 = vpop.f32.mrb[2].mxu0 }
 0x31d   : > { %v3829_v42 = vadd.f32 %v2437_v40, %v1005_v41  ;;  %v2688_v43 = vpop.f32.mrb[3].mxu0 }
 0x31f   : > { %2695 = vmatpush3.msra.mxu1 %v3829_v42 }
 0x320   : > { %2699 = vmatprep.subr.mxu1 %v3366_v37 }
 0x371   : > { %v1187_v1 = vpop.permute.xlu0 %1186 }
 0x3d5   : > { %v1082_v51 = vpop.f32.mrb[2].mxu1 }
 0x3d6   : > { %v1086_v52 = vmul.f32 0.17677669, %v1082_v51  ;;  %v2693_v53 = vpop.f32.mrb[3].mxu1 }
 0x3d8   : > { %v1094_v54 = vsel %vm1093_vm5, %v1086_v52, -1e+09 }
 0x3d9   : > { %v1096_v55 = vsel %vm1095_vm6, %v1094_v54, -inf }
 0x3da   : > { %1097 = vmax.xlane.f32.xlu1 %v1096_v55 }
 0x467   : > { %v1098_v56 = vpop.xlane.xlu1 %1097 }
 0x468   : > { %v1099_v57 = vsub.f32 %v1094_v54, %v1098_v56 }
 0x46a   : > { %v1100_v58 = vmul.f32 1.442695, %v1099_v57 }
 0x46c   : > { %3055 = vpow2.f32 %v1100_v58  ;;  %v1669_v58 = vld [vmem:[#allocation10 + $0x40] sm:$0xff] }
 0x476   : > { %v3056_v59 = vpop.eup %3055 }
 0x477   : > { %v1102_v60 = vsel %vm1095_vm6, %v3056_v59, 0.0 }
 0x478   : > { %1103 = vadd.xlane.f32.xlu1 %v1102_v60  ;;  %v1671_v60 = vld [vmem:[#allocation10 + $0x50] sm:$0xff] }
 0x489   : > { %1184 = vrot.lane.b32.xlu1 %v3819_v39, %s3367_s11 }
 0x505   : > { %v1104_v61 = vpop.xlane.xlu1 %1103 }
 0x506   : > { %3057 = vrcp.f32 %v1104_v61 }
 0x509   : > { %v1185_v2 = vpop.permute.xlu1 %1184 }
 0x510   : > { %v3058_v62 = vpop.eup %3057 }
 0x511   : > { %v1106_v63 = vmul.f32 %v3058_v62, %v3056_v59  ;;  %v1670_v59 = vld [vmem:[#allocation10 + $0x48] sm:$0xff]  ;;  %v1672_v62 = vld [vmem:[#allocation10 + $0x58] sm:$0xff] }
 0x512   : > { %v2858_v61 = vpack.c.bf16 %v1670_v59, %v1669_v58  ;;  %v2046_v58 = vld [vmem:[#allocation11 + $0x58] sm:$0xff] }
 0x513   : > { %2697 = vmatmul.mubr.msk.f32.vlgmr.msra.gmra.mrb[4].mxu1 %vm1095_vm6, %v1106_v63 }
 0x514   : > { %2700 = vmatpush3.xpose.msk.msra.mxu1 %vm1009_vm3, %v1187_v1  ;;  %2701 = vmatprep.mubr.msk.f32.mxu1 %vm3365_vm0, %v3366_v37 }
 0x515   : > { %2704 = vmatprep.subr.mxu1 %v3366_v37  ;;  %2859 = vmatpush3.bf16.msra.mxu0 %v2858_v61  ;;  %v2045_v61 = vld [vmem:[#allocation11 + $0x50] sm:$0xff] }
 0x516   : > { %2860 = vmatprep.subr.bf16.mxu0 %v3364_v10 }
 0x517   : > { %2702 = vmatmul.mubr.msk.f32.vlgmr.msra.gmra.mrb[6].mxu1 %vm1009_vm3, %v1185_v2 }
 0x518   : > { %2706 = vmatprep.mubr.msk.f32.mxu1 %vm3365_vm0, %v3366_v37 }
 0x5e6   : > { %v1176_v4 = vpop.f32.mrb[4].mxu1 }
 0x5e7   : > { %v2698_v5 = vpop.f32.mrb[5].mxu1 }
 0x5ea   : > { %v1258_v6 = vpop.f32.mrb[6].mxu1 }
 0x5eb   : > { %v1262_v7 = vmul.f32 0.17677669, %v1258_v6  ;;  %v2703_v8 = vpop.f32.mrb[7].mxu1 }
 0x5ed   : > { %v1263_v9 = vsel %vm1093_vm5, %v1262_v7, -1e+09 }
 0x5ee   : > { %v1264_v11 = vsel %vm1095_vm6, %v1263_v9, -inf }
 0x5ef   : > { %1265 = vmax.xlane.f32.xlu1 %v1264_v11 }
 0x600   : > { %1504 = vrot.lane.b32.xlu1 %v3813_v35, %s3369_s15 }
 0x604   : > { %1502 = vrot.lane.b32.xlu1 %v3819_v39, %s3369_s15 }
 0x67c   : > { %v1266_v12 = vpop.xlane.xlu1 %1265 }
 0x67d   : > { %v1267_v13 = vsub.f32 %v1263_v9, %v1266_v12 }
 0x67f   : > { %v1268_v3 = vmul.f32 1.442695, %v1267_v13 }
 0x680   : > { %v1505_v34 = vpop.permute.xlu1 %1504 }
 0x681   : > { %3059 = vpow2.f32 %v1268_v3 }
 0x684   : > { %v1503_v36 = vpop.permute.xlu1 %1502 }
 0x68b   : > { %v3060_v14 = vpop.eup %3059 }
 0x68c   : > { %v1270_v15 = vsel %vm1095_vm6, %v3060_v14, 0.0 }
 0x68d   : > { %1271 = vadd.xlane.f32.xlu0 %v1270_v15 }
 0x6a3   : > { %1276 = vrot.lane.b32.xlu0 %v3829_v42, %s3367_s11 }
 0x71a   : > { %v1272_v16 = vpop.xlane.xlu0 %1271 }
 0x71b   : > { %3061 = vrcp.f32 %v1272_v16 }
 0x71e   : > { %v1277_v17 = vpop.permute.xlu0 %1276 }
 0x71f   : > { %2705 = vmatpush3.msra.mxu1 %v1277_v17 }
 0x720   : > { %2845 = vmatprep.subr.bf16.mxu1 %v3364_v10 }
 0x725   : > { %v3062_v20 = vpop.eup %3061 }
 0x726   : > { %v1274_v22 = vmul.f32 %v3062_v20, %v3060_v14  ;;  %v1915_v20 = vld [vmem:[#allocation10 + $0x68] sm:$0xff] }
 0x728   : > { %2707 = vmatmul.mubr.msk.f32.vlgmr.msra.gmra.mrb[8].mxu1 %vm1095_vm6, %v1274_v22  ;;  %v1917_v22 = vld [vmem:[#allocation10 + $0x78] sm:$0xff] }
 0x729   : > { %2847 = vmatpush3.bf16.msra.mxu1 %v2846_v21  ;;  %2717 = vmatprep.mubr.msk.f32.mxu1 %vm3365_vm0, %v3366_v37  ;;  %v2864_v21 = vpack.c.bf16 %v1915_v20, %v1914_v19  ;;  %v2867_v23 = vpack.c.bf16 %v1917_v22, %v1916_v50  ;;  %v2059_v20 = vld [vmem:[#allocation11 + $0xc0] sm:$0xff]  ;;  %v2061_v50 = vld [vmem:[#allocation11 + $0xd0] sm:$0xff]  ;;  %v2066_v22 = vld [vmem:[#allocation11 + $0xf8] sm:$0xff] }
 0x72a   : > { %2848 = vmatprep.subr.bf16.mxu1 %v3364_v10 }
 0x72d   : > { %2850 = vmatpush3.bf16.msra.mxu1 %v2849_v25 }
 0x72e   : > { %2851 = vmatprep.subr.bf16.mxu1 %v3364_v10 }
 0x7fb   : > { %v1348_v31 = vpop.f32.mrb[8].mxu1 }
 0x7fc   : > { %v2708_v32 = vpop.f32.mrb[9].mxu1  ;;  %2718 = vmatmul.mubr.msk.f32.vlgmr.msra.gmra.mrb[10].mxu1 %vm1009_vm3, %v1348_v31 }
 0x7fd   : > { %2853 = vmatpush3.bf16.msra.mxu1 %v2852_v28  ;;  %2728 = vmatprep.mubr.msk.f32.mxu1 %vm3365_vm0, %v3366_v37 }
 0x7fe   : > { %2854 = vmatprep.subr.bf16.mxu1 %v3364_v10 }
 0x801   : > { %2856 = vmatpush3.bf16.msra.mxu1 %v2855_v33  ;;  %v2454_v33 = vld [vmem:[%s4069_s8] ss:$0 sm:$0xff]  ;;  %s4073_s8 = sld [smem:[#allocation30_spill]] }
 0x802   : > { %2731 = vmatprep.subr.mxu1 %v3366_v37 }
 0x804   : > { %2729 = vmatmul.mubr.msk.f32.vlgmr.msra.gmra.mrb[12].mxu1 %vm1009_vm3, %v1176_v4 }
 0x805   : > { %2733 = vmatprep.mubr.msk.f32.mxu1 %vm3365_vm0, %v3366_v37 }
 0x80a   : > { %2732 = vmatpush3.xpose.msk.msra.mxu1 %vm1009_vm3, %v1505_v34 }
 0x80b   : > { %2736 = vmatprep.subr.mxu1 %v3366_v37 }
 0x80d   : > { %2734 = vmatmul.mubr.msk.f32.vlgmr.msra.gmra.mrb[14].mxu1 %vm1009_vm3, %v1503_v36 }
 0x80e   : > { %2738 = vmatprep.mubr.msk.f32.mxu1 %vm3365_vm0, %v3366_v37 }
 0x8cf   : > { %v1425_v38 = vpop.f32.mrb[10].mxu1 }
 0x8d0   : > { %v2719_v40 = vpop.f32.mrb[11].mxu1 }
 0x8d7   : > { %v1498_v41 = vpop.f32.mrb[12].mxu1 }
 0x8d8   : > { %v3889_v43 = vadd.f32 %v1498_v41, %v1425_v38  ;;  %v2730_v44 = vpop.f32.mrb[13].mxu1 }
 0x8d9   : > { %v2038_v44 = vld [vmem:[#allocation11 + $0x18] sm:$0xff] }
 0x8e0   : > { %v1576_v45 = vpop.f32.mrb[14].mxu1 }
 0x8e1   : > { %v1580_v48 = vmul.f32 0.17677669, %v1576_v45  ;;  %v2735_v49 = vpop.f32.mrb[15].mxu1 }
 0x8e2   : > { %v2037_v49 = vld [vmem:[#allocation11 + $0x10] sm:$0xff] }
 0x8e3   : > { %v1581_v51 = vsel %vm1093_vm5, %v1580_v48, -1e+09  ;;  %v2035_v48 = vld [vmem:[#allocation11] sm:$0xff] }
 0x8e4   : > { %v1582_v52 = vsel %vm1095_vm6, %v1581_v51, -inf }
 0x8e5   : > { %1583 = vmax.xlane.f32.xlu1 %v1582_v52  ;;  %v2042_v52 = vld [vmem:[#allocation11 + $0x38] sm:$0xff] }
 0x8f6   : > { %1749 = vrot.lane.b32.xlu1 %v3813_v35, %s3370_s23  ;;  %v2861_v35 = vpack.c.bf16 %v1672_v62, %v1671_v60  ;;  %v2043_v60 = vld [vmem:[#allocation11 + $0x40] sm:$0xff] }
 0x8f7   : > { %v2879_v62 = vpack.c.bf16 %v2045_v61, %v2043_v60  ;;  %v2160_v60 = vld [vmem:[#allocation13 + $0x40] sm:$0xff]  ;;  %v2161_v61 = vld [vmem:[#allocation13 + $0x48] sm:$0xff] }
 0x8f8   : > { %2862 = vmatpush3.bf16.msra.mxu0 %v2861_v35  ;;  %v2048_v35 = vld [vmem:[#allocation11 + $0x68] sm:$0xff] }
 0x8f9   : > { %2863 = vmatprep.subr.bf16.mxu0 %v3364_v10 }
 0x8fa   : > { %1747 = vrot.lane.b32.xlu1 %v3819_v39, %s3370_s23 }
 0x972   : > { %v1584_v53 = vpop.xlane.xlu1 %1583 }
 0x973   : > { %v1585_v54 = vsub.f32 %v1581_v51, %v1584_v53  ;;  %v2871_v51 = vpack.c.bf16 %v2037_v49, %v2035_v48  ;;  %v2156_v48 = vld [vmem:[#allocation13 + $0x20] sm:$0xff]  ;;  %v2157_v49 = vld [vmem:[#allocation13 + $0x28] sm:$0xff] }
 0x975   : > { %v1586_v55 = vmul.f32 1.442695, %v1585_v54  ;;  %v2039_v54 = vld [vmem:[#allocation11 + $0x20] sm:$0xff] }
 0x976   : > { %v1750_v2 = vpop.permute.xlu1 %1749 }
 0x977   : > { %3063 = vpow2.f32 %v1586_v55  ;;  %v2041_v55 = vld [vmem:[#allocation11 + $0x30] sm:$0xff] }
 0x97a   : > { %v1748_v5 = vpop.permute.xlu1 %1747 }
 0x981   : > { %v3064_v56 = vpop.eup %3063 }
 0x982   : > { %v1588_v57 = vsel %vm1095_vm6, %v3064_v56, 0.0 }
 0x983   : > { %1589 = vadd.xlane.f32.xlu0 %v1588_v57  ;;  %v2044_v57 = vld [vmem:[#allocation11 + $0x48] sm:$0xff] }
 0x984   : > { %v2877_v59 = vpack.c.bf16 %v2046_v58, %v2044_v57  ;;  %v2177_v57 = vld [vmem:[#allocation13 + $0xc8] sm:$0xff] }
 0x999   : > { %1593 = vrot.lane.b32.xlu0 %v3829_v42, %s3369_s15  ;;  %s2264_s15 = scalar_lea.sflag [#allocation4], %s3734_s22 }
 0xa10   : > { %v1590_v39 = vpop.xlane.xlu0 %1589 }
 0xa11   : > { %3065 = vrcp.f32 %v1590_v39  ;;  %v2050_v39 = vld [vmem:[#allocation11 + $0x78] sm:$0xff] }
 0xa14   : > { %v1594_v63 = vpop.permute.xlu0 %1593 }
 0xa15   : > { %2737 = vmatpush3.msra.mxu1 %v1594_v63  ;;  %v2881_v63 = vpack.c.bf16 %v2050_v39, %v2048_v35  ;;  %v2179_v35 = vld [vmem:[#allocation13 + $0xd8] sm:$0xff]  ;;  %v2919_v39 = vpack.c.bf16 %v2161_v61, %v2160_v60 }
 0xa16   : > { %2752 = vmatprep.subr.mxu1 %v3366_v37 }
 0xa1b   : > { %v3066_v1 = vpop.eup %3065 }
 0xa1c   : > { %v1592_v4 = vmul.f32 %v3066_v1, %v3064_v56  ;;  %v2875_v56 = vpack.c.bf16 %v2041_v55, %v2039_v54  ;;  %v2047_v1 = vld [vmem:[#allocation11 + $0x60] sm:$0xff]  ;;  %v2158_v54 = vld [vmem:[#allocation13 + $0x30] sm:$0xff]  ;;  %v2159_v55 = vld [vmem:[#allocation13 + $0x38] sm:$0xff] }
 0xa1d   : > { %v2915_v58 = vpack.c.bf16 %v2159_v55, %v2158_v54 }
 0xa1e   : > { %2739 = vmatmul.mubr.msk.f32.vlgmr.msra.gmra.mrb[16].mxu1 %vm1095_vm6, %v1592_v4 }
 0xa1f   : > { %2753 = vmatpush3.xpose.msk.msra.mxu1 %vm1009_vm3, %v1750_v2  ;;  %2754 = vmatprep.mubr.msk.f32.mxu1 %vm3365_vm0, %v3366_v37  ;;  %v2049_v2 = vld [vmem:[#allocation11 + $0x70] sm:$0xff] }
 0xa20   : > { %2757 = vmatprep.subr.mxu1 %v3366_v37  ;;  %v2883_v4 = vpack.c.bf16 %v2049_v2, %v2047_v1  ;;  %v2162_v1 = vld [vmem:[#allocation13 + $0x50] sm:$0xff]  ;;  %v2163_v2 = vld [vmem:[#allocation13 + $0x58] sm:$0xff] }
 0xa22   : > { %2755 = vmatmul.mubr.msk.f32.vlgmr.msra.gmra.mrb[18].mxu1 %vm1009_vm3, %v1748_v5  ;;  %v2052_v5 = vld [vmem:[#allocation11 + $0x88] sm:$0xff] }
 0xa23   : > { %2759 = vmatprep.mubr.msk.f32.mxu1 %vm3365_vm0, %v3366_v37 }
 0xaf1   : > { %v1665_v6 = vpop.f32.mrb[16].mxu1 }
 0xaf2   : > { %v2740_v7 = vpop.f32.mrb[17].mxu1  ;;  %2750 = vmatmul.mubr.msk.f32.vlgmr.msra.gmra.mrb[4].mxu0 %vm1009_vm3, %v1665_v6  ;;  %v2054_v6 = vld [vmem:[#allocation11 + $0x98] sm:$0xff] }
 0xaf3   : > { %2770 = vmatprep.mubr.msk.f32.mxu0 %vm3365_vm0, %v3366_v37  ;;  %2865 = vmatpush3.bf16.msra.mxu0 %v2864_v21  ;;  %v2885_v7 = vpack.c.bf16 %v2054_v6, %v2052_v5  ;;  %v2064_v21 = vld [vmem:[#allocation11 + $0xe8] sm:$0xff]  ;;  %v2923_v6 = vpack.c.bf16 %v2163_v2, %v2162_v1 }
 0xaf4   : > { %2866 = vmatprep.subr.bf16.mxu0 %v3364_v10  ;;  %v2181_v5 = vld [vmem:[#allocation13 + $0xe8] sm:$0xff] }
 0xaf5   : > { %v1821_v8 = vpop.f32.mrb[18].mxu1 }
 0xaf6   : > { %v1825_v9 = vmul.f32 0.17677669, %v1821_v8  ;;  %v2756_v11 = vpop.f32.mrb[19].mxu1  ;;  %v2051_v8 = vld [vmem:[#allocation11 + $0x80] sm:$0xff] }
 0xaf7   : > { %2868 = vmatpush3.bf16.msra.mxu0 %v2867_v23  ;;  %v2056_v11 = vld [vmem:[#allocation11 + $0xa8] sm:$0xff]  ;;  %v2895_v23 = vpack.c.bf16 %v2061_v50, %v2059_v20 }
 0xaf8   : > { %v1826_v12 = vsel %vm1093_vm5, %v1825_v9, -1e+09  ;;  %v2053_v9 = vld [vmem:[#allocation11 + $0x90] sm:$0xff] }
 0xaf9   : > { %v1827_v13 = vsel %vm1095_vm6, %v1826_v12, -inf }
 0xafa   : > { %1828 = vmax.xlane.f32.xlu0 %v1827_v13  ;;  %v2058_v13 = vld [vmem:[#allocation11 + $0xb8] sm:$0xff] }
 0xb10   : > { %1838 = vrot.lane.b32.xlu0 %v3829_v42, %s3370_s23  ;;  %s4072_s23 = sld [smem:[#allocation29_spill]] }
 0xb87   : > { %v1829_v3 = vpop.xlane.xlu0 %1828 }
 0xb88   : > { %v1830_v14 = vsub.f32 %v1826_v12, %v1829_v3  ;;  %v2887_v12 = vpack.c.bf16 %v2053_v9, %v2051_v8  ;;  %v2055_v3 = vld [vmem:[#allocation11 + $0xa0] sm:$0xff] }
 0xb8a   : > { %v1831_v15 = vmul.f32 1.442695, %v1830_v14  ;;  %v2057_v14 = vld [vmem:[#allocation11 + $0xb0] sm:$0xff] }
 0xb8b   : > { %v1839_v16 = vpop.permute.xlu0 %1838 }
 0xb8c   : > { %3067 = vpow2.f32 %v1831_v15  ;;  %2758 = vmatpush3.msra.mxu1 %v1839_v16  ;;  %v2889_v15 = vpack.c.bf16 %v2058_v13, %v2056_v11  ;;  %v2060_v16 = vld [vmem:[#allocation11 + $0xc8] sm:$0xff] }
 0xb96   : > { %v3068_v17 = vpop.eup %3067 }
 0xb97   : > { %v1833_v18 = vsel %vm1095_vm6, %v3068_v17, 0.0 }
 0xb98   : > { %1834 = vadd.xlane.f32.xlu1 %v1833_v18  ;;  %v2891_v18 = vpack.c.bf16 %v2057_v14, %v2055_v3 }
 0xbc5   : > { %v1742_v42 = vpop.f32.mrb[4].mxu0 }
 0xbc6   : > { %v1746_v24 = vadd.f32 %v1742_v42, %v3889_v43  ;;  %v2751_v25 = vpop.f32.mrb[5].mxu0  ;;  %v2036_v43 = vld [vmem:[#allocation11 + $0x8] sm:$0xff]  ;;  %v2897_v42 = vpack.c.bf16 %v2066_v22, %v2064_v21  ;;  %v2164_v21 = vld [vmem:[#allocation13 + $0x60] sm:$0xff] }
 0xbc7   : > { %v2869_v45 = vpack.c.bf16 %v2038_v44, %v2036_v43  ;;  %v2065_v25 = vld [vmem:[#allocation11 + $0xf0] sm:$0xff]  ;;  %v2173_v43 = vld [vmem:[#allocation13 + $0xa8] sm:$0xff] }
 0xbc8   : > { %v2165_v22 = vld [vmem:[#allocation13 + $0x68] sm:$0xff] }
 0xbc9   : > { %2870 = vmatprep.subr.bf16.mxu1 %v2869_v45 }
 0xc25   : > { %v1835_v26 = vpop.xlane.xlu1 %1834 }
 0xc26   : > { %3069 = vrcp.f32 %v1835_v26 }
 0xc30   : > { %v3070_v27 = vpop.eup %3069 }
 0xc31   : > { %v1837_v28 = vmul.f32 %v3070_v27, %v3068_v17  ;;  %v2062_v17 = vld [vmem:[#allocation11 + $0xd8] sm:$0xff]  ;;  %v2168_v27 = vld [vmem:[#allocation13 + $0x80] sm:$0xff] }
 0xc32   : > { %v2893_v19 = vpack.c.bf16 %v2062_v17, %v2060_v16  ;;  %v2455_v16 = vld [vmem:[%s4070_s18] ss:$0 sm:$0xff]  ;;  %s2277_s18 = sshll.u32 %s688_s20, 4  ;;  %s3963_s18 = int_to_ptr.vmem [resolvable:$true] %s2277_s18 }
 0xc33   : > { %2760 = vmatmul.mubr.msk.f32.vlgmr.msra.gmra.mrb[20].mxu1 %vm1095_vm6, %v1837_v28  ;;  %v2169_v28 = vld [vmem:[#allocation13 + $0x88] sm:$0xff]  ;;  %p3280_p0 = scmp.lt.s32.totalorder %s3963_s18, %s3278_s12 }
 0xc34   : > { %2143 = vmatprep.mubr.f32.mxu1 %v3366_v37  ;;  %2872 = vmatpush1.bf16.msra.mxu1 %v2871_v51  ;;  %v2174_v51 = vld [vmem:[#allocation13 + $0xb0] sm:$0xff] }
 0xd06   : > { %v1910_v29 = vpop.f32.mrb[20].mxu1 }
 0xd07   : > { %v2761_v30 = vpop.f32.mrb[21].mxu1  ;;  %2771 = vmatmul.mubr.msk.f32.vlgmr.msra.gmra.mrb[6].mxu0 %vm1009_vm3, %v1910_v29  ;;  %v2152_v29 = vld [vmem:[#allocation13] sm:$0xff] }
 0xd08   : > { %v2901_v30 = vpack.c.bf16 %v2169_v28, %v2168_v27  ;;  %v2167_v27 = vld [vmem:[#allocation13 + $0x78] sm:$0xff] }
 0xd0a   : > { %2902 = vmatprep.subr.bf16.mxu0 %v2901_v30 }
 0xdda   : > { %v1987_v31 = vpop.f32.mrb[6].mxu0 }
 0xddb   : > { %v1991_v32 = vadd.f32 %v1987_v31, %v1746_v24  ;;  %v2772_v10 = vpop.f32.mrb[7].mxu0  ;;  %v2063_v24 = vld [vmem:[#allocation11 + $0xe0] sm:$0xff]  ;;  %v2153_v31 = vld [vmem:[#allocation13 + $0x8] sm:$0xff] }
 0xddc   : > { %v2899_v26 = vpack.c.bf16 %v2065_v25, %v2063_v24  ;;  %v2171_v10 = vld [vmem:[#allocation13 + $0x98] sm:$0xff] }
 0xddd   : > { %v1992_v34 = vadd.f32 %v1991_v32, %v3756_v0  ;;  %v2040_v0 = vld [vmem:[#allocation11 + $0x28] sm:$0xff]  ;;  %v2170_v32 = vld [vmem:[#allocation13 + $0x90] sm:$0xff]  ;;  %v2183_v24 = vld [vmem:[#allocation13 + $0xf8] sm:$0xff] }
 0xdde   : > { %v2873_v53 = vpack.c.bf16 %v2042_v52, %v2040_v0  ;;  %v2175_v0 = vld [vmem:[#allocation13 + $0xb8] sm:$0xff]  ;;  %v2911_v52 = vpack.c.bf16 %v2157_v49, %v2156_v48 }
 0xddf   : > { %v3930_v36 = vadd.f32 %v2454_v33, %v1992_v34  ;;  %v2903_v33 = vpack.c.bf16 %v2153_v31, %v2152_v29  ;;  %v2905_v34 = vpack.c.bf16 %v2171_v10, %v2170_v32  ;;  %v2075_v29 = vsub.s32 1, %v3838_v46 }
 0xde0   : > { %2874 = vmatprep.subr.bf16.mxu1 %v2873_v53  ;;  %v2913_v53 = vpack.c.bf16 %v2175_v0, %v2174_v51 }
 0xde1   : > { %2003 = vadd.xlane.f32.xlu1 %v3930_v36  ;;  %2876 = vmatpush1.bf16.msra.mxu1 %v2875_v56  ;;  %v2176_v56 = vld [vmem:[#allocation13 + $0xc0] sm:$0xff] }
 0xde2   : > { %2878 = vmatprep.subr.bf16.mxu1 %v2877_v59  ;;  %2904 = vmatpush3.bf16.msra.mxu0 %v2903_v33  ;;  %v2917_v59 = vpack.c.bf16 %v2177_v57, %v2176_v56 }
 0xde3   : > { %2906 = vmatprep.subr.bf16.mxu0 %v2905_v34 }
 0xde5   : > { %2880 = vmatpush1.bf16.msra.mxu1 %v2879_v62  ;;  %v2178_v62 = vld [vmem:[#allocation13 + $0xd0] sm:$0xff] }
 0xde6   : > { %2882 = vmatprep.subr.bf16.mxu1 %v2881_v63  ;;  %v2921_v63 = vpack.c.bf16 %v2179_v35, %v2178_v62 }
 0xde9   : > { %2884 = vmatpush1.bf16.msra.mxu1 %v2883_v4  ;;  %v2180_v4 = vld [vmem:[#allocation13 + $0xe0] sm:$0xff] }
 0xdea   : > { %2886 = vmatprep.subr.bf16.mxu1 %v2885_v7  ;;  %v2925_v7 = vpack.c.bf16 %v2181_v5, %v2180_v4 }
 0xded   : > { %2888 = vmatpush1.bf16.msra.mxu1 %v2887_v12 }
 0xdee   : > { %2890 = vmatprep.subr.bf16.mxu1 %v2889_v15 }
 0xdf1   : > { %2892 = vmatpush1.bf16.msra.mxu1 %v2891_v18 }
 0xdf2   : > { %2894 = vmatprep.subr.bf16.mxu1 %v2893_v19  ;;  %v2456_v19 = vld [vmem:[%s4071_s2] ss:$0 sm:$0xff]  ;;  %s4074_s2 = sld [smem:[#allocation31_spill]] }
 0xdf5   : > { %2896 = vmatpush1.bf16.msra.mxu1 %v2895_v23  ;;  %v2927_v23 = vpack.c.bf16 %v2165_v22, %v2164_v21 }
 0xdf6   : > { %2898 = vmatprep.subr.bf16.mxu1 %v2897_v42  ;;  %v2182_v42 = vld [vmem:[#allocation13 + $0xf0] sm:$0xff] }
 0xdf7   : > { %v2929_v25 = vpack.c.bf16 %v2183_v24, %v2182_v42 }
 0xdf8   : > { %s3961_s25 = scalar_lea.hbm %s4074_s2, %s2459_s13 }
 0xdf9   : > { %2900 = vmatpush1.bf16.msra.mxu1 %v2899_v26  ;;  %v2166_v26 = vld [vmem:[#allocation13 + $0x70] sm:$0xff] }
 0xdfa   : > { %v2931_v28 = vpack.c.bf16 %v2167_v27, %v2166_v26 }
 0xe6e   : > { %v2004_v38 = vpop.xlane.xlu1 %2003 }
 0xe6f   : > { %v2005_v40 = vmul.f32 0.0078125, %v2004_v38  ;;  %v2154_v38 = vld [vmem:[#allocation13 + $0x10] sm:$0xff] }
 0xe71   : > { %v3934_v37 = vsub.f32 %v3930_v36, %v2005_v40  ;;  %v2155_v40 = vld [vmem:[#allocation13 + $0x18] sm:$0xff] }
 0xe72   : > { %v2907_v44 = vpack.c.bf16 %v2155_v40, %v2154_v38 }
 0xe73   : > { %v2007_v41 = vmul.f32 %v3934_v37, %v3934_v37  ;;  %v2024_v17 = vmul.f32 %v2455_v16, %v3934_v37  ;;  %v2067_v37 = vld [vmem:[%s4072_s23] sm:$0x3]  ;;  %s3273_s23 = scalar_lea.vmem %s3963_s18, 128 }
 0xe74   : > { %2908 = vmatpush3.bf16.msra.mxu0 %v2907_v44  ;;  %v2072_v30 = vrot.slane %v2067_v37, %v1091_v47  ;;  %v2076_v31 = vrot.slane %v2067_v37, %v2075_v29  ;;  %p3274_p9 = scmp.ne.s32.totalorder %s3963_s18, %s3273_s23  ;;  %p3281_p2 = scmp.lt.s32.totalorder %s3279_s9, %s3273_s23 }
 0xe75   : > { %2008 = vadd.xlane.f32.xlu1 %v2007_v41  ;;  %v2172_v41 = vld [vmem:[#allocation13 + $0xa0] sm:$0xff] }
 0xe76   : > { %v2909_v45 = vpack.c.bf16 %v2173_v43, %v2172_v41  ;;  %v2457_v43 = vld [vmem:[%s4073_s8] ss:$0 sm:$0xff]  ;;  %p3275_p1 = pnand %p3274_p9, %p4075_p12  ;;  %p3282_p3 = por %p3281_p2, %p3280_p0 }
 0xe78   : > { %2910 = vmatprep.subr.bf16.mxu0 %v2909_v45  ;;  %p3276_p13 = pneg %p3275_p1 }
 0xe79   : > { %2912 = vmatpush3.bf16.msra.mxu0 %v2911_v52 }
 0xe7a   : > { %2914 = vmatprep.subr.bf16.mxu0 %v2913_v53  ;;  %p3283_p4 = pnand %p3282_p3, %p3276_p13 }
 0xe7d   : > { %2916 = vmatpush3.bf16.msra.mxu0 %v2915_v58 }
 0xe7e   : > { %2918 = vmatprep.subr.bf16.mxu0 %v2917_v59 }
 0xe81   : > { %2920 = vmatpush3.bf16.msra.mxu0 %v2919_v39 }
 0xe82   : > { %2922 = vmatprep.subr.bf16.mxu0 %v2921_v63 }
 0xe85   : > { %2924 = vmatpush3.bf16.msra.mxu0 %v2923_v6 }
 0xe86   : > { %2926 = vmatprep.subr.bf16.mxu0 %v2925_v7 }
 0xe89   : > { %2928 = vmatpush3.bf16.msra.mxu0 %v2927_v23 }
 0xe8a   : > { %2930 = vmatprep.subr.bf16.mxu0 %v2929_v25 }
 0xe8d   : > { %2932 = vmatpush3.bf16.msra.mxu0 %v2931_v28 }
 0xf02   : > { %v2009_v8 = vpop.xlane.xlu1 %2008 }
 0xf03   : > { %v2010_v9 = vmul.f32 0.007874016, %v2009_v8 }
 0xf05   : > { %3071 = vrsqrt.f32 %v2010_v9  ;;  %vm2013_vm7 = vcmp.eq.f32.partialorder %v2010_v9, inf  ;;  %v2016_v13 = vand.u32 2147483648, %v2010_v9  ;;  %vm2015_vm8 = vcmp.eq.f32.partialorder %v2010_v9, 0.0 }
 0xf0f   : > { %v3072_v11 = vpop.eup %3071 }
 0xf10   : > { %v2012_v12 = vmul.f32 %v3072_v11, %v2010_v9 }
 0xf12   : > { %v2014_v3 = vsel %vm2013_vm7, %v2010_v9, %v2012_v12 }
 0xf13   : > { %v2017_v14 = vsel %vm2015_vm8, %v2016_v13, %v2014_v3 }
 0xf14   : > { %v2025_v15 = vadd.f32 1e-06, %v2017_v14 }
 0xf16   : > { %3073 = vrcp.f32 %v2025_v15 }
 0xf20   : > { %v3074_v18 = vpop.eup %3073 }
 0xf21   : > { %v2027_v20 = vmul.f32 %v3074_v18, %v2024_v17 }
 0xf23   : > { %v2034_v50 = vadd.f32 %v2456_v19, %v2027_v20 }
 0xf25   : > { %2144 = vmatmul.mubr.f32.vlgmr.msra.gmra.mrb[22].mxu1 %v2034_v50 }
 0xff8   : > { %v2145_v32 = vpop.f32.mrb[22].mxu1 }
 0xff9   : > { %v2146_v10 = vadd.f32 %v2145_v32, %v2072_v30  ;;  %v2147_v33 = vpop.f32.mrb[23].mxu1 }
 0xffa   : > { %v2148_v34 = vadd.f32 %v2147_v33, %v2076_v31 }
 0xffb   : > { %v2150_v40 = vmax.f32 %v2146_v10, 0.0 }
 0xffc   : > { %v2151_v38 = vmax.f32 %v2148_v34, 0.0 }
 0xffe   : > { %2255 = vmatprep.mubr.f32.mxu0 %v2151_v38 }
 0xfff   : > { %2256 = vmatmul.mubr.f32.vlgmr.msra.gmra.mrb[8].mxu0 %v2150_v40 }
0x10d2   : > { %v2581_v41 = vpop.f32.mrb[8].mxu0 }
0x10d3   : > { %v2582_v44 = vpop.f32.mrb[9].mxu0 }
0x10d4   : > { %v2583_v46 = vadd.f32 %v2582_v44, %v2581_v41 }
0x10d6   : > { %v2258_v47 = vadd.f32 %v2583_v46, %v2457_v43 }
0x10d8   : > { %v2261_v45 = vadd.f32 %v2258_v47, %v3930_v36 }
0x10da   : > { %2262 = vst [vmem:[%s688_s20] sm:$0xff] %v2261_v45 }
0x10db   : > { %3286 = shalt.err (!%p3283_p4)
}
0x10dc   : > { %s3287_s22 = scalar_lea.hbm %s3961_s25, 128  ;;  %s3291_s13 = scalar_lea.hbm %s4074_s2, 256 }
0x10dd   : > { %p3288_p10 = scmp.ne.s32.totalorder %s3961_s25, %s3287_s22  ;;  %p3292_p5 = scmp.lt.u32.totalorder %s3961_s25, %s4074_s2 }
0x10de   : > { %p3293_p7 = scmp.lt.u32.totalorder %s3291_s13, %s3287_s22  ;;  %p3295_p9 = scmp.lt.u32.totalorder %s3287_s22, %s3961_s25 }
0x10df   : > { %p3289_p11 = pnand %p3288_p10, %p4075_p12 }
0x10e0   : > { %p3294_p6 = por %p3293_p7, %p3292_p5 }
0x10e1   : > { %p3290_p8 = pneg %p3289_p11 }
0x10e2   : > { %p3296_p1 = por %p3295_p9, %p3294_p6 }
0x10e4   : > { %p3297_p13 = pnand %p3296_p1, %p3290_p8 }
0x10e6   : > { %3300 = shalt.err (!%p3297_p13)
}
0x10e7   : > { %2959 = dma.vmem_to_hbm [thread:$0]  (%p4075_p12), %s3963_s18, 128, %s3961_s25, %s2264_s15  }
0x10e8 PF: > { %s2289_s17 = sand.u32 1, %s3339_s27   ;;  %p4076_p0 = scmp.ne.s32.totalorder %s4056_s19, 0 }
0x10e9   : > { %p4077_p2 = scmp.ge.s32.totalorder %s3351_s30, 2  ;;  %s2290_s23 = scalar_lea.sflag [#allocation4], %s2289_s17 }
0x10eb   : > { %p2985_p3 = pnand %p4077_p2, %p4076_p0 }
0x10ed   : > { %3334 = dma.done.wait (!%p2985_p3), %s2290_s23, 128  }
0x10ee   : > { %3336 = vsyncadd (!%p2985_p3), %s2290_s23, 4294967168  ;;  %p34_p4 = scmp.ge.s32.totalorder %s3658_s21, 4   ;;  %s4078_s27 = smov %s3343_s28 }
0x10ef   : > { %s4079_s28 = smov %s3347_s29  ;;  %s4080_s29 = smov %s3669_s24 }
0x10f0   : > { %s4081_s30 = smov %s3658_s21  ;;  %36 = sbr.rel (!%p34_p4) target bundleno = 21 (0x15), region = 164 }
0x10f7   :  { %2295 = vsyncpa [#allocation3], 1 }
0x10f8   :  { %2297 = vsyncpa [#allocation3 + $0x1], 1 }
0x10f9   :  { %2298 = vsyncpa [#allocation6], 1 }
0x10fa   :  { %2299 = vsyncpa [#allocation9], 1 }
0x10fb   :  { %2300 = vsyncpa [#allocation12], 1 }
0x10fc   :  { %2301 = vsyncpa [#allocation4], 1 }
0x10fd   :  { %2303 = vsyncpa [#allocation4 + $0x1], 1 }

</bundles_post_ra>
